<compile_context>
chip_gen: v7x
topology: tpu7x:2x2x1
jax: 0.10.0
libtpu: 0.0.40
codegen_flags: <defaults>
</compile_context>

<pallas_src>
import functools

import jax
import jax.numpy as jnp
from jax import lax
from jax.experimental import pallas as pl
from jax.experimental.pallas import tpu as pltpu


def _round_up(x, m):
    return ((x + m - 1) // m) * m


# ----------------------- Tiled matmul + bias kernel (MXU) ----------------------
def _matmul_bias_kernel(x_ref, w_ref, b_ref, o_ref):
    o_ref[...] = (jnp.dot(x_ref[...], w_ref[...],
                          preferred_element_type=jnp.float32)
                  + b_ref[...]).astype(o_ref.dtype)


def matmul_bias(x, w, b, *, tile_m=256, tile_n=1024):
    """y = x @ w + b with (M, N) tiling.  x:(M,K), w:(K,N), b:(1,N) -> (M,N)."""
    M, K = x.shape
    _, N = w.shape

    tm = min(tile_m, _round_up(M, 8))
    tn = min(tile_n, _round_up(N, 128))
    Mp = _round_up(M, tm)
    Np = _round_up(N, tn)

    xp = x if Mp == M else jnp.pad(x, ((0, Mp - M), (0, 0)))
    wp = w if Np == N else jnp.pad(w, ((0, 0), (0, Np - N)))
    bp = b if Np == N else jnp.pad(b, ((0, 0), (0, Np - N)))

    out = pl.pallas_call(
        _matmul_bias_kernel,
        out_shape=jax.ShapeDtypeStruct((Mp, Np), jnp.float32),
        grid_spec=pltpu.PrefetchScalarGridSpec(
            num_scalar_prefetch=0,
            grid=(Mp // tm, Np // tn),
            in_specs=[
                pl.BlockSpec((tm, K), lambda i, j: (i, 0)),
                pl.BlockSpec((K, tn), lambda i, j: (0, j)),
                pl.BlockSpec((1, tn), lambda i, j: (0, j)),
            ],
            out_specs=pl.BlockSpec((tm, tn), lambda i, j: (i, j)),
        ),
        compiler_params=pltpu.CompilerParams(
            dimension_semantics=("parallel", "parallel")),
    )(xp, wp, bp)

    if Mp != M or Np != N:
        out = out[:M, :N]
    return out


# ----------------------------- LSTM recurrence kernel ---------------------------
def _lstm_layer_kernel(gin_ref, h0_ref, c0_ref, whh_ref,
                       out_ref, hN_ref, cN_ref, h_sc, c_sc,
                       *, t_blk, t_real):
    """Recurrent part of one LSTM layer.  Grid iterates over time blocks.

    gin_ref : (T_BLK, B, 4H) precomputed x @ W_ih^T + b for this time block
    h0_ref  : (B, H)   initial hidden state
    c0_ref  : (B, H)   initial cell state
    whh_ref : (H, 4H)  hidden->gates weight (W_hh^T), gate order [i|f|g|o]
    out_ref : (T_BLK, B, H) per-step hidden outputs for this block
    hN_ref  : (B, H)   final hidden state (written once, last grid step)
    cN_ref  : (B, H)   final cell state   (written once, last grid step)
    h_sc/c_sc : VMEM scratch carrying the recurrence across grid steps
    """
    tb = pl.program_id(0)

    @pl.when(tb == 0)
    def _():
        h_sc[...] = h0_ref[...]
        c_sc[...] = c0_ref[...]

    Hp = h0_ref.shape[-1]
    w_hh = whh_ref[...]                      # load once per grid step
    pad_time = (t_real % t_blk) != 0         # static (Python) condition

    def step(i, carry):
        def body():
            h = h_sc[...]
            c = c_sc[...]
            gates = gin_ref[i] + jnp.dot(h, w_hh,
                                         preferred_element_type=jnp.float32)
            i_g = jax.nn.sigmoid(gates[:, 0 * Hp:1 * Hp])
            f_g = jax.nn.sigmoid(gates[:, 1 * Hp:2 * Hp])
            g_g = jnp.tanh(gates[:, 2 * Hp:3 * Hp])
            o_g = jax.nn.sigmoid(gates[:, 3 * Hp:4 * Hp])
            c_new = f_g * c + i_g * g_g
            h_new = o_g * jnp.tanh(c_new)
            h_sc[...] = h_new
            c_sc[...] = c_new
            out_ref[i] = h_new

        if pad_time:
            t_global = tb * t_blk + i

            pl.when(t_global < t_real)(body)

            @pl.when(t_global >= t_real)
            def _():
                out_ref[i] = jnp.zeros_like(h_sc)
        else:
            body()
        return carry

    lax.fori_loop(0, t_blk, step, 0, unroll=True)

    # Final states written exactly once (saves redundant vector stores per step).
    @pl.when(tb == pl.num_programs(0) - 1)
    def _():
        hN_ref[...] = h_sc[...]
        cN_ref[...] = c_sc[...]


def lstm_layer(gates_in, h0, c0, w_hh_t, *, t_real, t_blk):
    """gates_in: (Tp, Bp, 4Hp) time-major precomputed input gates.
    Returns (out (Tp,Bp,Hp), hN (Bp,Hp), cN (Bp,Hp))."""
    Tp, Bp, G = gates_in.shape
    Hp = w_hh_t.shape[0]
    n_blocks = Tp // t_blk

    kernel = functools.partial(_lstm_layer_kernel, t_blk=t_blk, t_real=t_real)

    out_shapes = (
        jax.ShapeDtypeStruct((Tp, Bp, Hp), jnp.float32),
        jax.ShapeDtypeStruct((Bp, Hp), jnp.float32),
        jax.ShapeDtypeStruct((Bp, Hp), jnp.float32),
    )

    grid_spec = pltpu.PrefetchScalarGridSpec(
        num_scalar_prefetch=0,
        grid=(n_blocks,),
        in_specs=[
            pl.BlockSpec((t_blk, Bp, G), lambda tb: (tb, 0, 0)),   # gates_in block
            pl.BlockSpec((Bp, Hp), lambda tb: (0, 0)),             # h0
            pl.BlockSpec((Bp, Hp), lambda tb: (0, 0)),             # c0
            pl.BlockSpec((Hp, G), lambda tb: (0, 0)),              # W_hh^T
        ],
        out_specs=[
            pl.BlockSpec((t_blk, Bp, Hp), lambda tb: (tb, 0, 0)),  # per-step output
            pl.BlockSpec((Bp, Hp), lambda tb: (0, 0)),             # final h
            pl.BlockSpec((Bp, Hp), lambda tb: (0, 0)),             # final c
        ],
        scratch_shapes=[
            pltpu.VMEM((Bp, Hp), jnp.float32),
            pltpu.VMEM((Bp, Hp), jnp.float32),
        ],
    )

    return pl.pallas_call(
        kernel,
        out_shape=out_shapes,
        grid_spec=grid_spec,
        compiler_params=pltpu.CompilerParams(
            dimension_semantics=("arbitrary",)),   # recurrence -> sequential
    )(gates_in, h0, c0, w_hh_t)


# --------------------------------- Parameters -----------------------------------
def init_params(key, vocab_size, embedding_dim, hidden_dim, num_layers):
    """Deterministic synthetic parameters, pre-padded to lane-dense TPU tiles.

    Gate order is PyTorch's [i; f; g; o]; each gate block is padded H -> Hp so that
    every gate slice inside the kernel is a whole number of 128-lane vregs.  All
    pads are zeros, so padded lanes stay exactly zero through the recurrence.
    """
    Ep = _round_up(embedding_dim, 128)
    Hp = _round_up(hidden_dim, 128)

    keys = jax.random.split(key, 3 + 4 * num_layers)

    emb = 0.1 * jax.random.normal(keys[0], (vocab_size, embedding_dim), jnp.float32)
    emb_p = jnp.pad(emb, ((0, 0), (0, Ep - embedding_dim)))          # (V, Ep)

    def pad_gate_rows(w, cols_to):
        # w: (4H, in)  ->  (4Hp, cols_to), padding each H-row gate block to Hp.
        w4 = w.reshape(4, hidden_dim, w.shape[-1])
        w4 = jnp.pad(w4, ((0, 0),
                          (0, Hp - hidden_dim),
                          (0, cols_to - w.shape[-1])))
        return w4.reshape(4 * Hp, cols_to)

    layers = []
    for l in range(num_layers):
        in_dim = embedding_dim if l == 0 else hidden_dim
        in_p = Ep if l == 0 else Hp
        k = keys[3 + 4 * l: 3 + 4 * (l + 1)]
        w_ih = 0.1 * jax.random.normal(k[0], (4 * hidden_dim, in_dim), jnp.float32)
        w_hh = 0.1 * jax.random.normal(k[1], (4 * hidden_dim, hidden_dim), jnp.float32)
        b_ih = 0.1 * jax.random.normal(k[2], (4 * hidden_dim,), jnp.float32)
        b_hh = 0.1 * jax.random.normal(k[3], (4 * hidden_dim,), jnp.float32)

        w_ih_p = pad_gate_rows(w_ih, in_p)                           # (4Hp, in_p)
        w_hh_p = pad_gate_rows(w_hh, Hp)                             # (4Hp, Hp)
        b = (b_ih + b_hh).reshape(4, hidden_dim)
        b_p = jnp.pad(b, ((0, 0), (0, Hp - hidden_dim))).reshape(1, 4 * Hp)

        layers.append({
            "w_ih_t": jnp.transpose(w_ih_p),                         # (in_p, 4Hp)
            "w_hh_t": jnp.transpose(w_hh_p),                         # (Hp, 4Hp)
            "b": b_p,                                                # (1, 4Hp)
        })

    w_fc = 0.1 * jax.random.normal(keys[1], (vocab_size, hidden_dim), jnp.float32)
    b_fc = 0.1 * jax.random.normal(keys[2], (vocab_size,), jnp.float32)
    w_fc_p = jnp.pad(w_fc, ((0, 0), (0, Hp - hidden_dim)))           # (V, Hp)

    return {
        "embedding": emb_p,                                          # (V, Ep)
        "lstm": layers,
        "fc_w_t": jnp.transpose(w_fc_p),                             # (Hp, V)
        "fc_b": b_fc.reshape(1, vocab_size),                         # (1, V)
    }


def init_hidden(num_layers, batch_size, hidden_dim):
    z = jnp.zeros((num_layers, batch_size, hidden_dim), jnp.float32)
    return (z, z)


# --------------------------------- Forward pass ----------------------------------
@functools.partial(jax.jit, static_argnames=("t_blk",))
def text_generation_lstm_forward(x_ids, hidden, params, t_blk=8):
    """Equivalent of TextGenerationLSTM.forward(x, hidden).

    x_ids  : (B, T) int32 token ids (batch_first, like PyTorch)
    hidden : (h0, c0) each (L, B, H)  (unpadded)
    returns: logits (B, T, V), (h_n, c_n) each (L, B, H)
    """
    h0_all, c0_all = hidden
    B, T = x_ids.shape
    L, _, H = h0_all.shape
    Hp = params["lstm"][0]["w_hh_t"].shape[0]
    V = params["fc_w_t"].shape[1]

    Bp = _round_up(B, 8)
    Tp = _round_up(T, t_blk)

    # Transpose the cheap int32 id matrix (not the big activations) -> time-major.
    ids_tb = jnp.transpose(x_ids, (1, 0))                            # (T, B)
    if (Tp, Bp) != (T, B):
        ids_tb = jnp.pad(ids_tb, ((0, Tp - T), (0, Bp - B)))
    # Embedding lookup (gather) — plain-JAX glue.
    x_tbe = jnp.take(params["embedding"], ids_tb, axis=0)            # (Tp, Bp, Ep)

    # Pad initial states (zero pads keep padded lanes exactly zero).
    h0p = jnp.pad(h0_all, ((0, 0), (0, Bp - B), (0, Hp - H)))
    c0p = jnp.pad(c0_all, ((0, 0), (0, Bp - B), (0, Hp - H)))

    layer_in = x_tbe
    h_finals, c_finals = [], []
    for l, lp in enumerate(params["lstm"]):
        # Hoisted input projection + bias as one big, tiled, parallel MXU matmul.
        K_in = layer_in.shape[-1]
        gates_in = matmul_bias(layer_in.reshape(Tp * Bp, K_in),
                               lp["w_ih_t"], lp["b"]).reshape(Tp, Bp, 4 * Hp)
        # Sequential recurrence: only h @ W_hh^T + elementwise per timestep.
        out_tbh, hN, cN = lstm_layer(gates_in, h0p[l], c0p[l], lp["w_hh_t"],
                                     t_real=T, t_blk=t_blk)
        h_finals.append(hN)
        c_finals.append(cN)
        layer_in = out_tbh                                           # stays time-major

    # Final Linear on the flattened time-major activations (tiled matmul kernel).
    logits_tm = matmul_bias(layer_in.reshape(Tp * Bp, Hp),
                            params["fc_w_t"], params["fc_b"])        # (Tp*Bp, V)
    logits = logits_tm.reshape(Tp, Bp, V)[:T, :B, :]                 # (T, B, V)
    logits = jnp.transpose(logits, (1, 0, 2))                        # (B, T, V)

    h_n = jnp.stack(h_finals, axis=0)[:, :B, :H]                     # (L, B, H)
    c_n = jnp.stack(c_finals, axis=0)[:, :B, :H]
    return logits, (h_n, c_n)


# ------------------------------------- main ---------------------------------------
if __name__ == "__main__":
    VOCAB = 64
    EMBED = 32
    HIDDEN = 32
    LAYERS = 2
    BATCH = 2
    SEQ = 8

    key = jax.random.PRNGKey(0)
    pkey, xkey = jax.random.split(key)

    params = init_params(pkey, VOCAB, EMBED, HIDDEN, LAYERS)
    x_ids = jax.random.randint(xkey, (BATCH, SEQ), 0, VOCAB, dtype=jnp.int32)
    hidden = init_hidden(LAYERS, BATCH, HIDDEN)

    logits, (h_n, c_n) = text_generation_lstm_forward(x_ids, hidden, params)
    jax.block_until_ready((logits, h_n, c_n))

    assert logits.shape == (BATCH, SEQ, VOCAB)
    assert h_n.shape == (LAYERS, BATCH, HIDDEN)
    assert c_n.shape == (LAYERS, BATCH, HIDDEN)
    print("KERNEL_OK")
</pallas_src>

<mosaic_0001>
module attributes {stable_mosaic.version = 11 : i64} {
  func.func @_matmul_bias_kernel(%arg0: i32, %arg1: i32, %arg2: memref<64x128xf32, #tpu.memory_space<vmem>>, %arg3: memref<128x512xf32, #tpu.memory_space<vmem>>, %arg4: memref<1x512xf32, #tpu.memory_space<vmem>>, %arg5: memref<64x512xf32, #tpu.memory_space<vmem>>) attributes {dimension_semantics = [#tpu.dimension_semantics<parallel>, #tpu.dimension_semantics<parallel>], iteration_bounds = array<i64: 1, 1>, scalar_prefetch = 0 : i64, scratch_operands = 0 : i64, tpu.core_type = #tpu.core_type<tc>, window_params = [{transform_indices = @transform_0, window_bounds = array<i64: 64, 128>}, {transform_indices = @transform_1, window_bounds = array<i64: 128, 512>}, {transform_indices = @transform_2, window_bounds = array<i64: 1, 512>}, {transform_indices = @transform_3, window_bounds = array<i64: 64, 512>}]} {
    %c0 = arith.constant 0 : index
    %c0_0 = arith.constant 0 : index
    %0 = vector.load %arg2[%c0, %c0_0] : memref<64x128xf32, #tpu.memory_space<vmem>>, vector<64x128xf32>
    %c0_1 = arith.constant 0 : index
    %c0_2 = arith.constant 0 : index
    %1 = vector.load %arg3[%c0_1, %c0_2] : memref<128x512xf32, #tpu.memory_space<vmem>>, vector<128x512xf32>
    %cst = arith.constant dense<0.000000e+00> : vector<64x512xf32>
    %2 = tpu.matmul %0, %1, %cst {dimension_numbers = #tpu.dot_dimension_numbers<[1], [0], [0], [1], [0, 0, 1, 1], [], []>} : vector<64x128xf32>, vector<128x512xf32>, vector<64x512xf32> -> vector<64x512xf32>
    %c0_3 = arith.constant 0 : index
    %c0_4 = arith.constant 0 : index
    %3 = vector.load %arg4[%c0_3, %c0_4] : memref<1x512xf32, #tpu.memory_space<vmem>>, vector<1x512xf32>
    %4 = vector.broadcast %3 : vector<1x512xf32> to vector<64x512xf32>
    %5 = arith.addf %2, %4 : vector<64x512xf32>
    %c0_5 = arith.constant 0 : index
    %c0_6 = arith.constant 0 : index
    %6 = vector.load %arg5[%c0_5, %c0_6] : memref<64x512xf32, #tpu.memory_space<vmem>>, vector<64x512xf32>
    tpu.vector_store %arg5[%c0_5, %c0_6], %5 {strides = array<i32>} : memref<64x512xf32, #tpu.memory_space<vmem>>, vector<64x512xf32>,
    return
  }
  func.func @transform_0(%arg0: i32, %arg1: i32) -> (i32, i32) {
    %c0_i32 = arith.constant 0 : i32
    %c0_i32_0 = arith.constant 0 : i32
    return %arg0, %c0_i32 : i32, i32
  }
  func.func @transform_1(%arg0: i32, %arg1: i32) -> (i32, i32) {
    %c0_i32 = arith.constant 0 : i32
    %c0_i32_0 = arith.constant 0 : i32
    return %c0_i32, %arg1 : i32, i32
  }
  func.func @transform_2(%arg0: i32, %arg1: i32) -> (i32, i32) {
    %c0_i32 = arith.constant 0 : i32
    %c0_i32_0 = arith.constant 0 : i32
    return %c0_i32, %arg1 : i32, i32
  }
  func.func @transform_3(%arg0: i32, %arg1: i32) -> (i32, i32) {
    %c0_i32 = arith.constant 0 : i32
    return %arg0, %arg1 : i32, i32
  }
}

module attributes {stable_mosaic.version = 11 : i64} {
  func.func @_matmul_bias_kernel(%arg0: i32, %arg1: i32, %arg2: memref<64x128xf32, #tpu.memory_space<vmem>>, %arg3: memref<128x128xf32, #tpu.memory_space<vmem>>, %arg4: memref<1x128xf32, #tpu.memory_space<vmem>>, %arg5: memref<64x128xf32, #tpu.memory_space<vmem>>) attributes {dimension_semantics = [#tpu.dimension_semantics<parallel>, #tpu.dimension_semantics<parallel>], iteration_bounds = array<i64: 1, 1>, scalar_prefetch = 0 : i64, scratch_operands = 0 : i64, tpu.core_type = #tpu.core_type<tc>, window_params = [{transform_indices = @transform_0, window_bounds = array<i64: 64, 128>}, {transform_indices = @transform_1, window_bounds = array<i64: 128, 128>}, {transform_indices = @transform_2, window_bounds = array<i64: 1, 128>}, {transform_indices = @transform_3, window_bounds = array<i64: 64, 128>}]} {
    %c0 = arith.constant 0 : index
    %c0_0 = arith.constant 0 : index
    %0 = vector.load %arg2[%c0, %c0_0] : memref<64x128xf32, #tpu.memory_space<vmem>>, vector<64x128xf32>
    %c0_1 = arith.constant 0 : index
    %c0_2 = arith.constant 0 : index
    %1 = vector.load %arg3[%c0_1, %c0_2] : memref<128x128xf32, #tpu.memory_space<vmem>>, vector<128x128xf32>
    %cst = arith.constant dense<0.000000e+00> : vector<64x128xf32>
    %2 = tpu.matmul %0, %1, %cst {dimension_numbers = #tpu.dot_dimension_numbers<[1], [0], [0], [1], [0, 0, 1, 1], [], []>} : vector<64x128xf32>, vector<128x128xf32>, vector<64x128xf32> -> vector<64x128xf32>
    %c0_3 = arith.constant 0 : index
    %c0_4 = arith.constant 0 : index
    %3 = vector.load %arg4[%c0_3, %c0_4] : memref<1x128xf32, #tpu.memory_space<vmem>>, vector<1x128xf32>
    %4 = vector.broadcast %3 : vector<1x128xf32> to vector<64x128xf32>
    %5 = arith.addf %2, %4 : vector<64x128xf32>
    %c0_5 = arith.constant 0 : index
    %c0_6 = arith.constant 0 : index
    %6 = vector.load %arg5[%c0_5, %c0_6] : memref<64x128xf32, #tpu.memory_space<vmem>>, vector<64x128xf32>
    tpu.vector_store %arg5[%c0_5, %c0_6], %5 {strides = array<i32>} : memref<64x128xf32, #tpu.memory_space<vmem>>, vector<64x128xf32>,
    return
  }
  func.func @transform_0(%arg0: i32, %arg1: i32) -> (i32, i32) {
    %c0_i32 = arith.constant 0 : i32
    %c0_i32_0 = arith.constant 0 : i32
    return %arg0, %c0_i32 : i32, i32
  }
  func.func @transform_1(%arg0: i32, %arg1: i32) -> (i32, i32) {
    %c0_i32 = arith.constant 0 : i32
    %c0_i32_0 = arith.constant 0 : i32
    return %c0_i32, %arg1 : i32, i32
  }
  func.func @transform_2(%arg0: i32, %arg1: i32) -> (i32, i32) {
    %c0_i32 = arith.constant 0 : i32
    %c0_i32_0 = arith.constant 0 : i32
    return %c0_i32, %arg1 : i32, i32
  }
  func.func @transform_3(%arg0: i32, %arg1: i32) -> (i32, i32) {
    %c0_i32 = arith.constant 0 : i32
    return %arg0, %arg1 : i32, i32
  }
}

module attributes {stable_mosaic.version = 11 : i64} {
  func.func @_lstm_layer_kernel(%arg0: i32, %arg1: memref<8x8x512xf32, #tpu.memory_space<vmem>>, %arg2: memref<8x128xf32, #tpu.memory_space<vmem>>, %arg3: memref<8x128xf32, #tpu.memory_space<vmem>>, %arg4: memref<128x512xf32, #tpu.memory_space<vmem>>, %arg5: memref<8x8x128xf32, #tpu.memory_space<vmem>>, %arg6: memref<8x128xf32, #tpu.memory_space<vmem>>, %arg7: memref<8x128xf32, #tpu.memory_space<vmem>>, %arg8: memref<8x128xf32, #tpu.memory_space<vmem>>, %arg9: memref<8x128xf32, #tpu.memory_space<vmem>>) attributes {dimension_semantics = [#tpu.dimension_semantics<arbitrary>], iteration_bounds = array<i64: 1>, scalar_prefetch = 0 : i64, scratch_operands = 2 : i64, tpu.core_type = #tpu.core_type<tc>, window_params = [{transform_indices = @transform_0, window_bounds = array<i64: 8, 8, 512>}, {pipeline_mode = #tpu.pipeline_mode<synchronous>, transform_indices = @transform_1, window_bounds = array<i64: 8, 128>}, {pipeline_mode = #tpu.pipeline_mode<synchronous>, transform_indices = @transform_2, window_bounds = array<i64: 8, 128>}, {pipeline_mode = #tpu.pipeline_mode<synchronous>, transform_indices = @transform_3, window_bounds = array<i64: 128, 512>}, {transform_indices = @transform_4, window_bounds = array<i64: 8, 8, 128>}, {pipeline_mode = #tpu.pipeline_mode<synchronous>, transform_indices = @transform_5, window_bounds = array<i64: 8, 128>}, {pipeline_mode = #tpu.pipeline_mode<synchronous>, transform_indices = @transform_6, window_bounds = array<i64: 8, 128>}]} {
    %c0_i32 = arith.constant 0 : i32
    %0 = arith.cmpi eq, %arg0, %c0_i32 : i32
    %1 = arith.extui %0 : i1 to i32
    %c0_i32_0 = arith.constant 0 : i32
    %2 = arith.cmpi ne, %1, %c0_i32_0 : i32
    scf.if %2 {
      %c0_132 = arith.constant 0 : index
      %c0_133 = arith.constant 0 : index
      %311 = vector.load %arg2[%c0_132, %c0_133] : memref<8x128xf32, #tpu.memory_space<vmem>>, vector<8x128xf32>
      %c0_134 = arith.constant 0 : index
      %c0_135 = arith.constant 0 : index
      %312 = vector.load %arg8[%c0_134, %c0_135] : memref<8x128xf32, #tpu.memory_space<vmem>>, vector<8x128xf32>
      tpu.vector_store %arg8[%c0_134, %c0_135], %311 {strides = array<i32>} : memref<8x128xf32, #tpu.memory_space<vmem>>, vector<8x128xf32>,
      %c0_136 = arith.constant 0 : index
      %c0_137 = arith.constant 0 : index
      %313 = vector.load %arg3[%c0_136, %c0_137] : memref<8x128xf32, #tpu.memory_space<vmem>>, vector<8x128xf32>
      %c0_138 = arith.constant 0 : index
      %c0_139 = arith.constant 0 : index
      %314 = vector.load %arg9[%c0_138, %c0_139] : memref<8x128xf32, #tpu.memory_space<vmem>>, vector<8x128xf32>
      tpu.vector_store %arg9[%c0_138, %c0_139], %313 {strides = array<i32>} : memref<8x128xf32, #tpu.memory_space<vmem>>, vector<8x128xf32>,
    } else {
    }
    %c0 = arith.constant 0 : index
    %c0_1 = arith.constant 0 : index
    %3 = vector.load %arg4[%c0, %c0_1] : memref<128x512xf32, #tpu.memory_space<vmem>>, vector<128x512xf32>
    %c0_i32_2 = arith.constant 0 : i32
    %c0_3 = arith.constant 0 : index
    %c0_4 = arith.constant 0 : index
    %4 = vector.load %arg8[%c0_3, %c0_4] : memref<8x128xf32, #tpu.memory_space<vmem>>, vector<8x128xf32>
    %c0_5 = arith.constant 0 : index
    %c0_6 = arith.constant 0 : index
    %5 = vector.load %arg9[%c0_5, %c0_6] : memref<8x128xf32, #tpu.memory_space<vmem>>, vector<8x128xf32>
    %6 = arith.index_cast %c0_i32_2 : i32 to index
    %c0_7 = arith.constant 0 : index
    %c0_8 = arith.constant 0 : index
    %7 = vector.load %arg1[%6, %c0_7, %c0_8] : memref<8x8x512xf32, #tpu.memory_space<vmem>>, vector<1x8x512xf32>
    %8 = vector.shape_cast %7 : vector<1x8x512xf32> to vector<8x512xf32>
    %cst = arith.constant dense<0.000000e+00> : vector<8x512xf32>
    %9 = tpu.matmul %4, %3, %cst {dimension_numbers = #tpu.dot_dimension_numbers<[1], [0], [0], [1], [0, 0, 1, 1], [], []>} : vector<8x128xf32>, vector<128x512xf32>, vector<8x512xf32> -> vector<8x512xf32>
    %10 = arith.addf %8, %9 : vector<8x512xf32>
    %11 = vector.extract_strided_slice %10 {offsets = [0, 0], sizes = [8, 128], strides = [1, 1]} : vector<8x512xf32> to vector<8x128xf32>
    %12 = arith.negf %11 : vector<8x128xf32>
    %13 = math.exp %12 : vector<8x128xf32>
    %cst_9 = arith.constant 1.000000e+00 : f32
    %14 = vector.broadcast %cst_9 : f32 to vector<8x128xf32>
    %15 = arith.addf %14, %13 : vector<8x128xf32>
    %16 = arith.divf %14, %15 : vector<8x128xf32>
    %17 = vector.extract_strided_slice %10 {offsets = [0, 128], sizes = [8, 128], strides = [1, 1]} : vector<8x512xf32> to vector<8x128xf32>
    %18 = arith.negf %17 : vector<8x128xf32>
    %19 = math.exp %18 : vector<8x128xf32>
    %cst_10 = arith.constant 1.000000e+00 : f32
    %20 = vector.broadcast %cst_10 : f32 to vector<8x128xf32>
    %21 = arith.addf %20, %19 : vector<8x128xf32>
    %22 = arith.divf %20, %21 : vector<8x128xf32>
    %23 = vector.extract_strided_slice %10 {offsets = [0, 256], sizes = [8, 128], strides = [1, 1]} : vector<8x512xf32> to vector<8x128xf32>
    %24 = math.tanh %23 : vector<8x128xf32>
    %25 = vector.extract_strided_slice %10 {offsets = [0, 384], sizes = [8, 128], strides = [1, 1]} : vector<8x512xf32> to vector<8x128xf32>
    %26 = arith.negf %25 : vector<8x128xf32>
    %27 = math.exp %26 : vector<8x128xf32>
    %cst_11 = arith.constant 1.000000e+00 : f32
    %28 = vector.broadcast %cst_11 : f32 to vector<8x128xf32>
    %29 = arith.addf %28, %27 : vector<8x128xf32>
    %30 = arith.divf %28, %29 : vector<8x128xf32>
    %31 = arith.mulf %22, %5 : vector<8x128xf32>
    %32 = arith.mulf %16, %24 : vector<8x128xf32>
    %33 = arith.addf %31, %32 : vector<8x128xf32>
    %34 = math.tanh %33 : vector<8x128xf32>
    %35 = arith.mulf %30, %34 : vector<8x128xf32>
    %c0_12 = arith.constant 0 : index
    %c0_13 = arith.constant 0 : index
    %36 = vector.load %arg8[%c0_12, %c0_13] : memref<8x128xf32, #tpu.memory_space<vmem>>, vector<8x128xf32>
    tpu.vector_store %arg8[%c0_12, %c0_13], %35 {strides = array<i32>} : memref<8x128xf32, #tpu.memory_space<vmem>>, vector<8x128xf32>,
    %c0_14 = arith.constant 0 : index
    %c0_15 = arith.constant 0 : index
    %37 = vector.load %arg9[%c0_14, %c0_15] : memref<8x128xf32, #tpu.memory_space<vmem>>, vector<8x128xf32>
    tpu.vector_store %arg9[%c0_14, %c0_15], %33 {strides = array<i32>} : memref<8x128xf32, #tpu.memory_space<vmem>>, vector<8x128xf32>,
    %38 = arith.index_cast %c0_i32_2 : i32 to index
    %c0_16 = arith.constant 0 : index
    %c0_17 = arith.constant 0 : index
    %39 = vector.load %arg5[%38, %c0_16, %c0_17] : memref<8x8x128xf32, #tpu.memory_space<vmem>>, vector<1x8x128xf32>
    %40 = vector.shape_cast %39 : vector<1x8x128xf32> to vector<8x128xf32>
    %41 = vector.shape_cast %35 : vector<8x128xf32> to vector<1x8x128xf32>
    tpu.vector_store %arg5[%38, %c0_16, %c0_17], %41 {strides = array<i32>} : memref<8x8x128xf32, #tpu.memory_space<vmem>>, vector<1x8x128xf32>,
    %c1_i32 = arith.constant 1 : i32
    %c0_18 = arith.constant 0 : index
    %c0_19 = arith.constant 0 : index
    %42 = vector.load %arg8[%c0_18, %c0_19] : memref<8x128xf32, #tpu.memory_space<vmem>>, vector<8x128xf32>
    %c0_20 = arith.constant 0 : index
    %c0_21 = arith.constant 0 : index
    %43 = vector.load %arg9[%c0_20, %c0_21] : memref<8x128xf32, #tpu.memory_space<vmem>>, vector<8x128xf32>
    %44 = arith.index_cast %c1_i32 : i32 to index
    %c0_22 = arith.constant 0 : index
    %c0_23 = arith.constant 0 : index
    %45 = vector.load %arg1[%44, %c0_22, %c0_23] : memref<8x8x512xf32, #tpu.memory_space<vmem>>, vector<1x8x512xf32>
    %46 = vector.shape_cast %45 : vector<1x8x512xf32> to vector<8x512xf32>
    %cst_24 = arith.constant dense<0.000000e+00> : vector<8x512xf32>
    %47 = tpu.matmul %42, %3, %cst_24 {dimension_numbers = #tpu.dot_dimension_numbers<[1], [0], [0], [1], [0, 0, 1, 1], [], []>} : vector<8x128xf32>, vector<128x512xf32>, vector<8x512xf32> -> vector<8x512xf32>
    %48 = arith.addf %46, %47 : vector<8x512xf32>
    %49 = vector.extract_strided_slice %48 {offsets = [0, 0], sizes = [8, 128], strides = [1, 1]} : vector<8x512xf32> to vector<8x128xf32>
    %50 = arith.negf %49 : vector<8x128xf32>
    %51 = math.exp %50 : vector<8x128xf32>
    %cst_25 = arith.constant 1.000000e+00 : f32
    %52 = vector.broadcast %cst_25 : f32 to vector<8x128xf32>
    %53 = arith.addf %52, %51 : vector<8x128xf32>
    %54 = arith.divf %52, %53 : vector<8x128xf32>
    %55 = vector.extract_strided_slice %48 {offsets = [0, 128], sizes = [8, 128], strides = [1, 1]} : vector<8x512xf32> to vector<8x128xf32>
    %56 = arith.negf %55 : vector<8x128xf32>
    %57 = math.exp %56 : vector<8x128xf32>
    %cst_26 = arith.constant 1.000000e+00 : f32
    %58 = vector.broadcast %cst_26 : f32 to vector<8x128xf32>
    %59 = arith.addf %58, %57 : vector<8x128xf32>
    %60 = arith.divf %58, %59 : vector<8x128xf32>
    %61 = vector.extract_strided_slice %48 {offsets = [0, 256], sizes = [8, 128], strides = [1, 1]} : vector<8x512xf32> to vector<8x128xf32>
    %62 = math.tanh %61 : vector<8x128xf32>
    %63 = vector.extract_strided_slice %48 {offsets = [0, 384], sizes = [8, 128], strides = [1, 1]} : vector<8x512xf32> to vector<8x128xf32>
    %64 = arith.negf %63 : vector<8x128xf32>
    %65 = math.exp %64 : vector<8x128xf32>
    %cst_27 = arith.constant 1.000000e+00 : f32
    %66 = vector.broadcast %cst_27 : f32 to vector<8x128xf32>
    %67 = arith.addf %66, %65 : vector<8x128xf32>
    %68 = arith.divf %66, %67 : vector<8x128xf32>
    %69 = arith.mulf %60, %43 : vector<8x128xf32>
    %70 = arith.mulf %54, %62 : vector<8x128xf32>
    %71 = arith.addf %69, %70 : vector<8x128xf32>
    %72 = math.tanh %71 : vector<8x128xf32>
    %73 = arith.mulf %68, %72 : vector<8x128xf32>
    %c0_28 = arith.constant 0 : index
    %c0_29 = arith.constant 0 : index
    %74 = vector.load %arg8[%c0_28, %c0_29] : memref<8x128xf32, #tpu.memory_space<vmem>>, vector<8x128xf32>
    tpu.vector_store %arg8[%c0_28, %c0_29], %73 {strides = array<i32>} : memref<8x128xf32, #tpu.memory_space<vmem>>, vector<8x128xf32>,
    %c0_30 = arith.constant 0 : index
    %c0_31 = arith.constant 0 : index
    %75 = vector.load %arg9[%c0_30, %c0_31] : memref<8x128xf32, #tpu.memory_space<vmem>>, vector<8x128xf32>
    tpu.vector_store %arg9[%c0_30, %c0_31], %71 {strides = array<i32>} : memref<8x128xf32, #tpu.memory_space<vmem>>, vector<8x128xf32>,
    %76 = arith.index_cast %c1_i32 : i32 to index
    %c0_32 = arith.constant 0 : index
    %c0_33 = arith.constant 0 : index
    %77 = vector.load %arg5[%76, %c0_32, %c0_33] : memref<8x8x128xf32, #tpu.memory_space<vmem>>, vector<1x8x128xf32>
    %78 = vector.shape_cast %77 : vector<1x8x128xf32> to vector<8x128xf32>
    %79 = vector.shape_cast %73 : vector<8x128xf32> to vector<1x8x128xf32>
    tpu.vector_store %arg5[%76, %c0_32, %c0_33], %79 {strides = array<i32>} : memref<8x8x128xf32, #tpu.memory_space<vmem>>, vector<1x8x128xf32>,
    %c2_i32 = arith.constant 2 : i32
    %c0_34 = arith.constant 0 : index
    %c0_35 = arith.constant 0 : index
    %80 = vector.load %arg8[%c0_34, %c0_35] : memref<8x128xf32, #tpu.memory_space<vmem>>, vector<8x128xf32>
    %c0_36 = arith.constant 0 : index
    %c0_37 = arith.constant 0 : index
    %81 = vector.load %arg9[%c0_36, %c0_37] : memref<8x128xf32, #tpu.memory_space<vmem>>, vector<8x128xf32>
    %82 = arith.index_cast %c2_i32 : i32 to index
    %c0_38 = arith.constant 0 : index
    %c0_39 = arith.constant 0 : index
    %83 = vector.load %arg1[%82, %c0_38, %c0_39] : memref<8x8x512xf32, #tpu.memory_space<vmem>>, vector<1x8x512xf32>
    %84 = vector.shape_cast %83 : vector<1x8x512xf32> to vector<8x512xf32>
    %cst_40 = arith.constant dense<0.000000e+00> : vector<8x512xf32>
    %85 = tpu.matmul %80, %3, %cst_40 {dimension_numbers = #tpu.dot_dimension_numbers<[1], [0], [0], [1], [0, 0, 1, 1], [], []>} : vector<8x128xf32>, vector<128x512xf32>, vector<8x512xf32> -> vector<8x512xf32>
    %86 = arith.addf %84, %85 : vector<8x512xf32>
    %87 = vector.extract_strided_slice %86 {offsets = [0, 0], sizes = [8, 128], strides = [1, 1]} : vector<8x512xf32> to vector<8x128xf32>
    %88 = arith.negf %87 : vector<8x128xf32>
    %89 = math.exp %88 : vector<8x128xf32>
    %cst_41 = arith.constant 1.000000e+00 : f32
    %90 = vector.broadcast %cst_41 : f32 to vector<8x128xf32>
    %91 = arith.addf %90, %89 : vector<8x128xf32>
    %92 = arith.divf %90, %91 : vector<8x128xf32>
    %93 = vector.extract_strided_slice %86 {offsets = [0, 128], sizes = [8, 128], strides = [1, 1]} : vector<8x512xf32> to vector<8x128xf32>
    %94 = arith.negf %93 : vector<8x128xf32>
    %95 = math.exp %94 : vector<8x128xf32>
    %cst_42 = arith.constant 1.000000e+00 : f32
    %96 = vector.broadcast %cst_42 : f32 to vector<8x128xf32>
    %97 = arith.addf %96, %95 : vector<8x128xf32>
    %98 = arith.divf %96, %97 : vector<8x128xf32>
    %99 = vector.extract_strided_slice %86 {offsets = [0, 256], sizes = [8, 128], strides = [1, 1]} : vector<8x512xf32> to vector<8x128xf32>
    %100 = math.tanh %99 : vector<8x128xf32>
    %101 = vector.extract_strided_slice %86 {offsets = [0, 384], sizes = [8, 128], strides = [1, 1]} : vector<8x512xf32> to vector<8x128xf32>
    %102 = arith.negf %101 : vector<8x128xf32>
    %103 = math.exp %102 : vector<8x128xf32>
    %cst_43 = arith.constant 1.000000e+00 : f32
    %104 = vector.broadcast %cst_43 : f32 to vector<8x128xf32>
    %105 = arith.addf %104, %103 : vector<8x128xf32>
    %106 = arith.divf %104, %105 : vector<8x128xf32>
    %107 = arith.mulf %98, %81 : vector<8x128xf32>
    %108 = arith.mulf %92, %100 : vector<8x128xf32>
    %109 = arith.addf %107, %108 : vector<8x128xf32>
    %110 = math.tanh %109 : vector<8x128xf32>
    %111 = arith.mulf %106, %110 : vector<8x128xf32>
    %c0_44 = arith.constant 0 : index
    %c0_45 = arith.constant 0 : index
    %112 = vector.load %arg8[%c0_44, %c0_45] : memref<8x128xf32, #tpu.memory_space<vmem>>, vector<8x128xf32>
    tpu.vector_store %arg8[%c0_44, %c0_45], %111 {strides = array<i32>} : memref<8x128xf32, #tpu.memory_space<vmem>>, vector<8x128xf32>,
    %c0_46 = arith.constant 0 : index
    %c0_47 = arith.constant 0 : index
    %113 = vector.load %arg9[%c0_46, %c0_47] : memref<8x128xf32, #tpu.memory_space<vmem>>, vector<8x128xf32>
    tpu.vector_store %arg9[%c0_46, %c0_47], %109 {strides = array<i32>} : memref<8x128xf32, #tpu.memory_space<vmem>>, vector<8x128xf32>,
    %114 = arith.index_cast %c2_i32 : i32 to index
    %c0_48 = arith.constant 0 : index
    %c0_49 = arith.constant 0 : index
    %115 = vector.load %arg5[%114, %c0_48, %c0_49] : memref<8x8x128xf32, #tpu.memory_space<vmem>>, vector<1x8x128xf32>
    %116 = vector.shape_cast %115 : vector<1x8x128xf32> to vector<8x128xf32>
    %117 = vector.shape_cast %111 : vector<8x128xf32> to vector<1x8x128xf32>
    tpu.vector_store %arg5[%114, %c0_48, %c0_49], %117 {strides = array<i32>} : memref<8x8x128xf32, #tpu.memory_space<vmem>>, vector<1x8x128xf32>,
    %c3_i32 = arith.constant 3 : i32
    %c0_50 = arith.constant 0 : index
    %c0_51 = arith.constant 0 : index
    %118 = vector.load %arg8[%c0_50, %c0_51] : memref<8x128xf32, #tpu.memory_space<vmem>>, vector<8x128xf32>
    %c0_52 = arith.constant 0 : index
    %c0_53 = arith.constant 0 : index
    %119 = vector.load %arg9[%c0_52, %c0_53] : memref<8x128xf32, #tpu.memory_space<vmem>>, vector<8x128xf32>
    %120 = arith.index_cast %c3_i32 : i32 to index
    %c0_54 = arith.constant 0 : index
    %c0_55 = arith.constant 0 : index
    %121 = vector.load %arg1[%120, %c0_54, %c0_55] : memref<8x8x512xf32, #tpu.memory_space<vmem>>, vector<1x8x512xf32>
    %122 = vector.shape_cast %121 : vector<1x8x512xf32> to vector<8x512xf32>
    %cst_56 = arith.constant dense<0.000000e+00> : vector<8x512xf32>
    %123 = tpu.matmul %118, %3, %cst_56 {dimension_numbers = #tpu.dot_dimension_numbers<[1], [0], [0], [1], [0, 0, 1, 1], [], []>} : vector<8x128xf32>, vector<128x512xf32>, vector<8x512xf32> -> vector<8x512xf32>
    %124 = arith.addf %122, %123 : vector<8x512xf32>
    %125 = vector.extract_strided_slice %124 {offsets = [0, 0], sizes = [8, 128], strides = [1, 1]} : vector<8x512xf32> to vector<8x128xf32>
    %126 = arith.negf %125 : vector<8x128xf32>
    %127 = math.exp %126 : vector<8x128xf32>
    %cst_57 = arith.constant 1.000000e+00 : f32
    %128 = vector.broadcast %cst_57 : f32 to vector<8x128xf32>
    %129 = arith.addf %128, %127 : vector<8x128xf32>
    %130 = arith.divf %128, %129 : vector<8x128xf32>
    %131 = vector.extract_strided_slice %124 {offsets = [0, 128], sizes = [8, 128], strides = [1, 1]} : vector<8x512xf32> to vector<8x128xf32>
    %132 = arith.negf %131 : vector<8x128xf32>
    %133 = math.exp %132 : vector<8x128xf32>
    %cst_58 = arith.constant 1.000000e+00 : f32
    %134 = vector.broadcast %cst_58 : f32 to vector<8x128xf32>
    %135 = arith.addf %134, %133 : vector<8x128xf32>
    %136 = arith.divf %134, %135 : vector<8x128xf32>
    %137 = vector.extract_strided_slice %124 {offsets = [0, 256], sizes = [8, 128], strides = [1, 1]} : vector<8x512xf32> to vector<8x128xf32>
    %138 = math.tanh %137 : vector<8x128xf32>
    %139 = vector.extract_strided_slice %124 {offsets = [0, 384], sizes = [8, 128], strides = [1, 1]} : vector<8x512xf32> to vector<8x128xf32>
    %140 = arith.negf %139 : vector<8x128xf32>
    %141 = math.exp %140 : vector<8x128xf32>
    %cst_59 = arith.constant 1.000000e+00 : f32
    %142 = vector.broadcast %cst_59 : f32 to vector<8x128xf32>
    %143 = arith.addf %142, %141 : vector<8x128xf32>
    %144 = arith.divf %142, %143 : vector<8x128xf32>
    %145 = arith.mulf %136, %119 : vector<8x128xf32>
    %146 = arith.mulf %130, %138 : vector<8x128xf32>
    %147 = arith.addf %145, %146 : vector<8x128xf32>
    %148 = math.tanh %147 : vector<8x128xf32>
    %149 = arith.mulf %144, %148 : vector<8x128xf32>
    %c0_60 = arith.constant 0 : index
    %c0_61 = arith.constant 0 : index
    %150 = vector.load %arg8[%c0_60, %c0_61] : memref<8x128xf32, #tpu.memory_space<vmem>>, vector<8x128xf32>
    tpu.vector_store %arg8[%c0_60, %c0_61], %149 {strides = array<i32>} : memref<8x128xf32, #tpu.memory_space<vmem>>, vector<8x128xf32>,
    %c0_62 = arith.constant 0 : index
    %c0_63 = arith.constant 0 : index
    %151 = vector.load %arg9[%c0_62, %c0_63] : memref<8x128xf32, #tpu.memory_space<vmem>>, vector<8x128xf32>
    tpu.vector_store %arg9[%c0_62, %c0_63], %147 {strides = array<i32>} : memref<8x128xf32, #tpu.memory_space<vmem>>, vector<8x128xf32>,
    %152 = arith.index_cast %c3_i32 : i32 to index
    %c0_64 = arith.constant 0 : index
    %c0_65 = arith.constant 0 : index
    %153 = vector.load %arg5[%152, %c0_64, %c0_65] : memref<8x8x128xf32, #tpu.memory_space<vmem>>, vector<1x8x128xf32>
    %154 = vector.shape_cast %153 : vector<1x8x128xf32> to vector<8x128xf32>
    %155 = vector.shape_cast %149 : vector<8x128xf32> to vector<1x8x128xf32>
    tpu.vector_store %arg5[%152, %c0_64, %c0_65], %155 {strides = array<i32>} : memref<8x8x128xf32, #tpu.memory_space<vmem>>, vector<1x8x128xf32>,
    %c4_i32 = arith.constant 4 : i32
    %c0_66 = arith.constant 0 : index
    %c0_67 = arith.constant 0 : index
    %156 = vector.load %arg8[%c0_66, %c0_67] : memref<8x128xf32, #tpu.memory_space<vmem>>, vector<8x128xf32>
    %c0_68 = arith.constant 0 : index
    %c0_69 = arith.constant 0 : index
    %157 = vector.load %arg9[%c0_68, %c0_69] : memref<8x128xf32, #tpu.memory_space<vmem>>, vector<8x128xf32>
    %158 = arith.index_cast %c4_i32 : i32 to index
    %c0_70 = arith.constant 0 : index
    %c0_71 = arith.constant 0 : index
    %159 = vector.load %arg1[%158, %c0_70, %c0_71] : memref<8x8x512xf32, #tpu.memory_space<vmem>>, vector<1x8x512xf32>
    %160 = vector.shape_cast %159 : vector<1x8x512xf32> to vector<8x512xf32>
    %cst_72 = arith.constant dense<0.000000e+00> : vector<8x512xf32>
    %161 = tpu.matmul %156, %3, %cst_72 {dimension_numbers = #tpu.dot_dimension_numbers<[1], [0], [0], [1], [0, 0, 1, 1], [], []>} : vector<8x128xf32>, vector<128x512xf32>, vector<8x512xf32> -> vector<8x512xf32>
    %162 = arith.addf %160, %161 : vector<8x512xf32>
    %163 = vector.extract_strided_slice %162 {offsets = [0, 0], sizes = [8, 128], strides = [1, 1]} : vector<8x512xf32> to vector<8x128xf32>
    %164 = arith.negf %163 : vector<8x128xf32>
    %165 = math.exp %164 : vector<8x128xf32>
    %cst_73 = arith.constant 1.000000e+00 : f32
    %166 = vector.broadcast %cst_73 : f32 to vector<8x128xf32>
    %167 = arith.addf %166, %165 : vector<8x128xf32>
    %168 = arith.divf %166, %167 : vector<8x128xf32>
    %169 = vector.extract_strided_slice %162 {offsets = [0, 128], sizes = [8, 128], strides = [1, 1]} : vector<8x512xf32> to vector<8x128xf32>
    %170 = arith.negf %169 : vector<8x128xf32>
    %171 = math.exp %170 : vector<8x128xf32>
    %cst_74 = arith.constant 1.000000e+00 : f32
    %172 = vector.broadcast %cst_74 : f32 to vector<8x128xf32>
    %173 = arith.addf %172, %171 : vector<8x128xf32>
    %174 = arith.divf %172, %173 : vector<8x128xf32>
    %175 = vector.extract_strided_slice %162 {offsets = [0, 256], sizes = [8, 128], strides = [1, 1]} : vector<8x512xf32> to vector<8x128xf32>
    %176 = math.tanh %175 : vector<8x128xf32>
    %177 = vector.extract_strided_slice %162 {offsets = [0, 384], sizes = [8, 128], strides = [1, 1]} : vector<8x512xf32> to vector<8x128xf32>
    %178 = arith.negf %177 : vector<8x128xf32>
    %179 = math.exp %178 : vector<8x128xf32>
    %cst_75 = arith.constant 1.000000e+00 : f32
    %180 = vector.broadcast %cst_75 : f32 to vector<8x128xf32>
    %181 = arith.addf %180, %179 : vector<8x128xf32>
    %182 = arith.divf %180, %181 : vector<8x128xf32>
    %183 = arith.mulf %174, %157 : vector<8x128xf32>
    %184 = arith.mulf %168, %176 : vector<8x128xf32>
    %185 = arith.addf %183, %184 : vector<8x128xf32>
    %186 = math.tanh %185 : vector<8x128xf32>
    %187 = arith.mulf %182, %186 : vector<8x128xf32>
    %c0_76 = arith.constant 0 : index
    %c0_77 = arith.constant 0 : index
    %188 = vector.load %arg8[%c0_76, %c0_77] : memref<8x128xf32, #tpu.memory_space<vmem>>, vector<8x128xf32>
    tpu.vector_store %arg8[%c0_76, %c0_77], %187 {strides = array<i32>} : memref<8x128xf32, #tpu.memory_space<vmem>>, vector<8x128xf32>,
    %c0_78 = arith.constant 0 : index
    %c0_79 = arith.constant 0 : index
    %189 = vector.load %arg9[%c0_78, %c0_79] : memref<8x128xf32, #tpu.memory_space<vmem>>, vector<8x128xf32>
    tpu.vector_store %arg9[%c0_78, %c0_79], %185 {strides = array<i32>} : memref<8x128xf32, #tpu.memory_space<vmem>>, vector<8x128xf32>,
    %190 = arith.index_cast %c4_i32 : i32 to index
    %c0_80 = arith.constant 0 : index
    %c0_81 = arith.constant 0 : index
    %191 = vector.load %arg5[%190, %c0_80, %c0_81] : memref<8x8x128xf32, #tpu.memory_space<vmem>>, vector<1x8x128xf32>
    %192 = vector.shape_cast %191 : vector<1x8x128xf32> to vector<8x128xf32>
    %193 = vector.shape_cast %187 : vector<8x128xf32> to vector<1x8x128xf32>
    tpu.vector_store %arg5[%190, %c0_80, %c0_81], %193 {strides = array<i32>} : memref<8x8x128xf32, #tpu.memory_space<vmem>>, vector<1x8x128xf32>,
    %c5_i32 = arith.constant 5 : i32
    %c0_82 = arith.constant 0 : index
    %c0_83 = arith.constant 0 : index
    %194 = vector.load %arg8[%c0_82, %c0_83] : memref<8x128xf32, #tpu.memory_space<vmem>>, vector<8x128xf32>
    %c0_84 = arith.constant 0 : index
    %c0_85 = arith.constant 0 : index
    %195 = vector.load %arg9[%c0_84, %c0_85] : memref<8x128xf32, #tpu.memory_space<vmem>>, vector<8x128xf32>
    %196 = arith.index_cast %c5_i32 : i32 to index
    %c0_86 = arith.constant 0 : index
    %c0_87 = arith.constant 0 : index
    %197 = vector.load %arg1[%196, %c0_86, %c0_87] : memref<8x8x512xf32, #tpu.memory_space<vmem>>, vector<1x8x512xf32>
    %198 = vector.shape_cast %197 : vector<1x8x512xf32> to vector<8x512xf32>
    %cst_88 = arith.constant dense<0.000000e+00> : vector<8x512xf32>
    %199 = tpu.matmul %194, %3, %cst_88 {dimension_numbers = #tpu.dot_dimension_numbers<[1], [0], [0], [1], [0, 0, 1, 1], [], []>} : vector<8x128xf32>, vector<128x512xf32>, vector<8x512xf32> -> vector<8x512xf32>
    %200 = arith.addf %198, %199 : vector<8x512xf32>
    %201 = vector.extract_strided_slice %200 {offsets = [0, 0], sizes = [8, 128], strides = [1, 1]} : vector<8x512xf32> to vector<8x128xf32>
    %202 = arith.negf %201 : vector<8x128xf32>
    %203 = math.exp %202 : vector<8x128xf32>
    %cst_89 = arith.constant 1.000000e+00 : f32
    %204 = vector.broadcast %cst_89 : f32 to vector<8x128xf32>
    %205 = arith.addf %204, %203 : vector<8x128xf32>
    %206 = arith.divf %204, %205 : vector<8x128xf32>
    %207 = vector.extract_strided_slice %200 {offsets = [0, 128], sizes = [8, 128], strides = [1, 1]} : vector<8x512xf32> to vector<8x128xf32>
    %208 = arith.negf %207 : vector<8x128xf32>
    %209 = math.exp %208 : vector<8x128xf32>
    %cst_90 = arith.constant 1.000000e+00 : f32
    %210 = vector.broadcast %cst_90 : f32 to vector<8x128xf32>
    %211 = arith.addf %210, %209 : vector<8x128xf32>
    %212 = arith.divf %210, %211 : vector<8x128xf32>
    %213 = vector.extract_strided_slice %200 {offsets = [0, 256], sizes = [8, 128], strides = [1, 1]} : vector<8x512xf32> to vector<8x128xf32>
    %214 = math.tanh %213 : vector<8x128xf32>
    %215 = vector.extract_strided_slice %200 {offsets = [0, 384], sizes = [8, 128], strides = [1, 1]} : vector<8x512xf32> to vector<8x128xf32>
    %216 = arith.negf %215 : vector<8x128xf32>
    %217 = math.exp %216 : vector<8x128xf32>
    %cst_91 = arith.constant 1.000000e+00 : f32
    %218 = vector.broadcast %cst_91 : f32 to vector<8x128xf32>
    %219 = arith.addf %218, %217 : vector<8x128xf32>
    %220 = arith.divf %218, %219 : vector<8x128xf32>
    %221 = arith.mulf %212, %195 : vector<8x128xf32>
    %222 = arith.mulf %206, %214 : vector<8x128xf32>
    %223 = arith.addf %221, %222 : vector<8x128xf32>
    %224 = math.tanh %223 : vector<8x128xf32>
    %225 = arith.mulf %220, %224 : vector<8x128xf32>
    %c0_92 = arith.constant 0 : index
    %c0_93 = arith.constant 0 : index
    %226 = vector.load %arg8[%c0_92, %c0_93] : memref<8x128xf32, #tpu.memory_space<vmem>>, vector<8x128xf32>
    tpu.vector_store %arg8[%c0_92, %c0_93], %225 {strides = array<i32>} : memref<8x128xf32, #tpu.memory_space<vmem>>, vector<8x128xf32>,
    %c0_94 = arith.constant 0 : index
    %c0_95 = arith.constant 0 : index
    %227 = vector.load %arg9[%c0_94, %c0_95] : memref<8x128xf32, #tpu.memory_space<vmem>>, vector<8x128xf32>
    tpu.vector_store %arg9[%c0_94, %c0_95], %223 {strides = array<i32>} : memref<8x128xf32, #tpu.memory_space<vmem>>, vector<8x128xf32>,
    %228 = arith.index_cast %c5_i32 : i32 to index
    %c0_96 = arith.constant 0 : index
    %c0_97 = arith.constant 0 : index
    %229 = vector.load %arg5[%228, %c0_96, %c0_97] : memref<8x8x128xf32, #tpu.memory_space<vmem>>, vector<1x8x128xf32>
    %230 = vector.shape_cast %229 : vector<1x8x128xf32> to vector<8x128xf32>
    %231 = vector.shape_cast %225 : vector<8x128xf32> to vector<1x8x128xf32>
    tpu.vector_store %arg5[%228, %c0_96, %c0_97], %231 {strides = array<i32>} : memref<8x8x128xf32, #tpu.memory_space<vmem>>, vector<1x8x128xf32>,
    %c6_i32 = arith.constant 6 : i32
    %c0_98 = arith.constant 0 : index
    %c0_99 = arith.constant 0 : index
    %232 = vector.load %arg8[%c0_98, %c0_99] : memref<8x128xf32, #tpu.memory_space<vmem>>, vector<8x128xf32>
    %c0_100 = arith.constant 0 : index
    %c0_101 = arith.constant 0 : index
    %233 = vector.load %arg9[%c0_100, %c0_101] : memref<8x128xf32, #tpu.memory_space<vmem>>, vector<8x128xf32>
    %234 = arith.index_cast %c6_i32 : i32 to index
    %c0_102 = arith.constant 0 : index
    %c0_103 = arith.constant 0 : index
    %235 = vector.load %arg1[%234, %c0_102, %c0_103] : memref<8x8x512xf32, #tpu.memory_space<vmem>>, vector<1x8x512xf32>
    %236 = vector.shape_cast %235 : vector<1x8x512xf32> to vector<8x512xf32>
    %cst_104 = arith.constant dense<0.000000e+00> : vector<8x512xf32>
    %237 = tpu.matmul %232, %3, %cst_104 {dimension_numbers = #tpu.dot_dimension_numbers<[1], [0], [0], [1], [0, 0, 1, 1], [], []>} : vector<8x128xf32>, vector<128x512xf32>, vector<8x512xf32> -> vector<8x512xf32>
    %238 = arith.addf %236, %237 : vector<8x512xf32>
    %239 = vector.extract_strided_slice %238 {offsets = [0, 0], sizes = [8, 128], strides = [1, 1]} : vector<8x512xf32> to vector<8x128xf32>
    %240 = arith.negf %239 : vector<8x128xf32>
    %241 = math.exp %240 : vector<8x128xf32>
    %cst_105 = arith.constant 1.000000e+00 : f32
    %242 = vector.broadcast %cst_105 : f32 to vector<8x128xf32>
    %243 = arith.addf %242, %241 : vector<8x128xf32>
    %244 = arith.divf %242, %243 : vector<8x128xf32>
    %245 = vector.extract_strided_slice %238 {offsets = [0, 128], sizes = [8, 128], strides = [1, 1]} : vector<8x512xf32> to vector<8x128xf32>
    %246 = arith.negf %245 : vector<8x128xf32>
    %247 = math.exp %246 : vector<8x128xf32>
    %cst_106 = arith.constant 1.000000e+00 : f32
    %248 = vector.broadcast %cst_106 : f32 to vector<8x128xf32>
    %249 = arith.addf %248, %247 : vector<8x128xf32>
    %250 = arith.divf %248, %249 : vector<8x128xf32>
    %251 = vector.extract_strided_slice %238 {offsets = [0, 256], sizes = [8, 128], strides = [1, 1]} : vector<8x512xf32> to vector<8x128xf32>
    %252 = math.tanh %251 : vector<8x128xf32>
    %253 = vector.extract_strided_slice %238 {offsets = [0, 384], sizes = [8, 128], strides = [1, 1]} : vector<8x512xf32> to vector<8x128xf32>
    %254 = arith.negf %253 : vector<8x128xf32>
    %255 = math.exp %254 : vector<8x128xf32>
    %cst_107 = arith.constant 1.000000e+00 : f32
    %256 = vector.broadcast %cst_107 : f32 to vector<8x128xf32>
    %257 = arith.addf %256, %255 : vector<8x128xf32>
    %258 = arith.divf %256, %257 : vector<8x128xf32>
    %259 = arith.mulf %250, %233 : vector<8x128xf32>
    %260 = arith.mulf %244, %252 : vector<8x128xf32>
    %261 = arith.addf %259, %260 : vector<8x128xf32>
    %262 = math.tanh %261 : vector<8x128xf32>
    %263 = arith.mulf %258, %262 : vector<8x128xf32>
    %c0_108 = arith.constant 0 : index
    %c0_109 = arith.constant 0 : index
    %264 = vector.load %arg8[%c0_108, %c0_109] : memref<8x128xf32, #tpu.memory_space<vmem>>, vector<8x128xf32>
    tpu.vector_store %arg8[%c0_108, %c0_109], %263 {strides = array<i32>} : memref<8x128xf32, #tpu.memory_space<vmem>>, vector<8x128xf32>,
    %c0_110 = arith.constant 0 : index
    %c0_111 = arith.constant 0 : index
    %265 = vector.load %arg9[%c0_110, %c0_111] : memref<8x128xf32, #tpu.memory_space<vmem>>, vector<8x128xf32>
    tpu.vector_store %arg9[%c0_110, %c0_111], %261 {strides = array<i32>} : memref<8x128xf32, #tpu.memory_space<vmem>>, vector<8x128xf32>,
    %266 = arith.index_cast %c6_i32 : i32 to index
    %c0_112 = arith.constant 0 : index
    %c0_113 = arith.constant 0 : index
    %267 = vector.load %arg5[%266, %c0_112, %c0_113] : memref<8x8x128xf32, #tpu.memory_space<vmem>>, vector<1x8x128xf32>
    %268 = vector.shape_cast %267 : vector<1x8x128xf32> to vector<8x128xf32>
    %269 = vector.shape_cast %263 : vector<8x128xf32> to vector<1x8x128xf32>
    tpu.vector_store %arg5[%266, %c0_112, %c0_113], %269 {strides = array<i32>} : memref<8x8x128xf32, #tpu.memory_space<vmem>>, vector<1x8x128xf32>,
    %c7_i32 = arith.constant 7 : i32
    %c0_114 = arith.constant 0 : index
    %c0_115 = arith.constant 0 : index
    %270 = vector.load %arg8[%c0_114, %c0_115] : memref<8x128xf32, #tpu.memory_space<vmem>>, vector<8x128xf32>
    %c0_116 = arith.constant 0 : index
    %c0_117 = arith.constant 0 : index
    %271 = vector.load %arg9[%c0_116, %c0_117] : memref<8x128xf32, #tpu.memory_space<vmem>>, vector<8x128xf32>
    %272 = arith.index_cast %c7_i32 : i32 to index
    %c0_118 = arith.constant 0 : index
    %c0_119 = arith.constant 0 : index
    %273 = vector.load %arg1[%272, %c0_118, %c0_119] : memref<8x8x512xf32, #tpu.memory_space<vmem>>, vector<1x8x512xf32>
    %274 = vector.shape_cast %273 : vector<1x8x512xf32> to vector<8x512xf32>
    %cst_120 = arith.constant dense<0.000000e+00> : vector<8x512xf32>
    %275 = tpu.matmul %270, %3, %cst_120 {dimension_numbers = #tpu.dot_dimension_numbers<[1], [0], [0], [1], [0, 0, 1, 1], [], []>} : vector<8x128xf32>, vector<128x512xf32>, vector<8x512xf32> -> vector<8x512xf32>
    %276 = arith.addf %274, %275 : vector<8x512xf32>
    %277 = vector.extract_strided_slice %276 {offsets = [0, 0], sizes = [8, 128], strides = [1, 1]} : vector<8x512xf32> to vector<8x128xf32>
    %278 = arith.negf %277 : vector<8x128xf32>
    %279 = math.exp %278 : vector<8x128xf32>
    %cst_121 = arith.constant 1.000000e+00 : f32
    %280 = vector.broadcast %cst_121 : f32 to vector<8x128xf32>
    %281 = arith.addf %280, %279 : vector<8x128xf32>
    %282 = arith.divf %280, %281 : vector<8x128xf32>
    %283 = vector.extract_strided_slice %276 {offsets = [0, 128], sizes = [8, 128], strides = [1, 1]} : vector<8x512xf32> to vector<8x128xf32>
    %284 = arith.negf %283 : vector<8x128xf32>
    %285 = math.exp %284 : vector<8x128xf32>
    %cst_122 = arith.constant 1.000000e+00 : f32
    %286 = vector.broadcast %cst_122 : f32 to vector<8x128xf32>
    %287 = arith.addf %286, %285 : vector<8x128xf32>
    %288 = arith.divf %286, %287 : vector<8x128xf32>
    %289 = vector.extract_strided_slice %276 {offsets = [0, 256], sizes = [8, 128], strides = [1, 1]} : vector<8x512xf32> to vector<8x128xf32>
    %290 = math.tanh %289 : vector<8x128xf32>
    %291 = vector.extract_strided_slice %276 {offsets = [0, 384], sizes = [8, 128], strides = [1, 1]} : vector<8x512xf32> to vector<8x128xf32>
    %292 = arith.negf %291 : vector<8x128xf32>
    %293 = math.exp %292 : vector<8x128xf32>
    %cst_123 = arith.constant 1.000000e+00 : f32
    %294 = vector.broadcast %cst_123 : f32 to vector<8x128xf32>
    %295 = arith.addf %294, %293 : vector<8x128xf32>
    %296 = arith.divf %294, %295 : vector<8x128xf32>
    %297 = arith.mulf %288, %271 : vector<8x128xf32>
    %298 = arith.mulf %282, %290 : vector<8x128xf32>
    %299 = arith.addf %297, %298 : vector<8x128xf32>
    %300 = math.tanh %299 : vector<8x128xf32>
    %301 = arith.mulf %296, %300 : vector<8x128xf32>
    %c0_124 = arith.constant 0 : index
    %c0_125 = arith.constant 0 : index
    %302 = vector.load %arg8[%c0_124, %c0_125] : memref<8x128xf32, #tpu.memory_space<vmem>>, vector<8x128xf32>
    tpu.vector_store %arg8[%c0_124, %c0_125], %301 {strides = array<i32>} : memref<8x128xf32, #tpu.memory_space<vmem>>, vector<8x128xf32>,
    %c0_126 = arith.constant 0 : index
    %c0_127 = arith.constant 0 : index
    %303 = vector.load %arg9[%c0_126, %c0_127] : memref<8x128xf32, #tpu.memory_space<vmem>>, vector<8x128xf32>
    tpu.vector_store %arg9[%c0_126, %c0_127], %299 {strides = array<i32>} : memref<8x128xf32, #tpu.memory_space<vmem>>, vector<8x128xf32>,
    %304 = arith.index_cast %c7_i32 : i32 to index
    %c0_128 = arith.constant 0 : index
    %c0_129 = arith.constant 0 : index
    %305 = vector.load %arg5[%304, %c0_128, %c0_129] : memref<8x8x128xf32, #tpu.memory_space<vmem>>, vector<1x8x128xf32>
    %306 = vector.shape_cast %305 : vector<1x8x128xf32> to vector<8x128xf32>
    %307 = vector.shape_cast %301 : vector<8x128xf32> to vector<1x8x128xf32>
    tpu.vector_store %arg5[%304, %c0_128, %c0_129], %307 {strides = array<i32>} : memref<8x8x128xf32, #tpu.memory_space<vmem>>, vector<1x8x128xf32>,
    %c8_i32 = arith.constant 8 : i32
    %c0_i32_130 = arith.constant 0 : i32
    %308 = arith.cmpi eq, %arg0, %c0_i32_130 : i32
    %309 = arith.extui %308 : i1 to i32
    %c0_i32_131 = arith.constant 0 : i32
    %310 = arith.cmpi ne, %309, %c0_i32_131 : i32
    scf.if %310 {
      %c0_132 = arith.constant 0 : index
      %c0_133 = arith.constant 0 : index
      %311 = vector.load %arg8[%c0_132, %c0_133] : memref<8x128xf32, #tpu.memory_space<vmem>>, vector<8x128xf32>
      %c0_134 = arith.constant 0 : index
      %c0_135 = arith.constant 0 : index
      %312 = vector.load %arg6[%c0_134, %c0_135] : memref<8x128xf32, #tpu.memory_space<vmem>>, vector<8x128xf32>
      tpu.vector_store %arg6[%c0_134, %c0_135], %311 {strides = array<i32>} : memref<8x128xf32, #tpu.memory_space<vmem>>, vector<8x128xf32>,
      %c0_136 = arith.constant 0 : index
      %c0_137 = arith.constant 0 : index
      %313 = vector.load %arg9[%c0_136, %c0_137] : memref<8x128xf32, #tpu.memory_space<vmem>>, vector<8x128xf32>
      %c0_138 = arith.constant 0 : index
      %c0_139 = arith.constant 0 : index
      %314 = vector.load %arg7[%c0_138, %c0_139] : memref<8x128xf32, #tpu.memory_space<vmem>>, vector<8x128xf32>
      tpu.vector_store %arg7[%c0_138, %c0_139], %313 {strides = array<i32>} : memref<8x128xf32, #tpu.memory_space<vmem>>, vector<8x128xf32>,
    } else {
    }
    return
  }
  func.func @transform_0(%arg0: i32) -> (i32, i32, i32) {
    %c0_i32 = arith.constant 0 : i32
    %c0_i32_0 = arith.constant 0 : i32
    %c0_i32_1 = arith.constant 0 : i32
    return %arg0, %c0_i32, %c0_i32_0 : i32, i32, i32
  }
  func.func @transform_1(%arg0: i32) -> (i32, i32) {
    %c0_i32 = arith.constant 0 : i32
    %c0_i32_0 = arith.constant 0 : i32
    %c0_i32_1 = arith.constant 0 : i32
    return %c0_i32, %c0_i32_0 : i32, i32
  }
  func.func @transform_2(%arg0: i32) -> (i32, i32) {
    %c0_i32 = arith.constant 0 : i32
    %c0_i32_0 = arith.constant 0 : i32
    %c0_i32_1 = arith.constant 0 : i32
    return %c0_i32, %c0_i32_0 : i32, i32
  }
  func.func @transform_3(%arg0: i32) -> (i32, i32) {
    %c0_i32 = arith.constant 0 : i32
    %c0_i32_0 = arith.constant 0 : i32
    %c0_i32_1 = arith.constant 0 : i32
    return %c0_i32, %c0_i32_0 : i32, i32
  }
  func.func @transform_4(%arg0: i32) -> (i32, i32, i32) {
    %c0_i32 = arith.constant 0 : i32
    %c0_i32_0 = arith.constant 0 : i32
    %c0_i32_1 = arith.constant 0 : i32
    return %arg0, %c0_i32, %c0_i32_0 : i32, i32, i32
  }
  func.func @transform_5(%arg0: i32) -> (i32, i32) {
    %c0_i32 = arith.constant 0 : i32
    %c0_i32_0 = arith.constant 0 : i32
    %c0_i32_1 = arith.constant 0 : i32
    return %c0_i32, %c0_i32_0 : i32, i32
  }
  func.func @transform_6(%arg0: i32) -> (i32, i32) {
    %c0_i32 = arith.constant 0 : i32
    %c0_i32_0 = arith.constant 0 : i32
    %c0_i32_1 = arith.constant 0 : i32
    return %c0_i32, %c0_i32_0 : i32, i32
  }
}

</mosaic_0001>

<bundles_post_ra>
// kernel: text_generation_lstm_forward.9
= control target key start
LH: loop header
LB: loop body
LE: loop exit
PB: predicated region body
PF: predicated region fallthrough
CT: control target
= control target key end

     0   :  { %s398_s1 = inlined_call_operand.vmem [shape: f32[128,128], index: 1, kind: input, shape index: {}]   ;;  %s399_s0 = inlined_call_operand.vmem [shape: f32[64,128], index: 0, kind: input, shape index: {}]   ;;  %s400_s2 = inlined_call_operand.vmem [shape: f32[1,128], index: 2, kind: input, shape index: {}]   ;;  %s401_s3 = inlined_call_operand.vmem [shape: f32[64,128], index: 3, kind: output, shape index: {}]  }
   0x1   :  { %v22_v0 = vld [vmem:[%s398_s1] sm:$0xff]  ;;  %v23_v1 = vld [vmem:[%s398_s1 + $0x8] sm:$0xff]  ;;  %v24_v2 = vld [vmem:[%s398_s1 + $0x10] sm:$0xff] }
   0x2   :  { %v231_v3 = vpack.c.bf16 %v23_v1, %v22_v0  ;;  %v25_v4 = vld [vmem:[%s398_s1 + $0x18] sm:$0xff]  ;;  %v26_v6 = vld [vmem:[%s398_s1 + $0x20] sm:$0xff]  ;;  %v27_v7 = vld [vmem:[%s398_s1 + $0x28] sm:$0xff] }
   0x3   :  { %v235_v5 = vpack.c.bf16 %v25_v4, %v24_v2  ;;  %v239_v8 = vpack.c.bf16 %v27_v7, %v26_v6  ;;  %v14_v9 = vld [vmem:[%s399_s0] sm:$0xff]  ;;  %v28_v11 = vld [vmem:[%s398_s1 + $0x30] sm:$0xff]  ;;  %v29_v12 = vld [vmem:[%s398_s1 + $0x38] sm:$0xff] }
   0x4   :  { %232 = vmatprep.subr.bf16.mxu0 %v231_v3  ;;  %263 = vmatprep.subr.bf16.mxu1 %v231_v3  ;;  %v18_v10 = vld [vmem:[%s399_s0 + $0x20] sm:$0xff]  ;;  %v243_v13 = vpack.c.bf16 %v29_v12, %v28_v11  ;;  %v31_v15 = vld [vmem:[%s398_s1 + $0x48] sm:$0xff]  ;;  %v32_v17 = vld [vmem:[%s398_s1 + $0x50] sm:$0xff] }
   0x5   :  { %234 = vmatpush3.bf16.msra.mxu0 %v231_v3  ;;  %271 = vmatpush3.bf16.msra.mxu1 %v231_v3  ;;  %v30_v14 = vld [vmem:[%s398_s1 + $0x40] sm:$0xff]  ;;  %v33_v18 = vld [vmem:[%s398_s1 + $0x58] sm:$0xff]  ;;  %v35_v21 = vld [vmem:[%s398_s1 + $0x68] sm:$0xff] }
   0x6   :  { %236 = vmatprep.subr.bf16.mxu0 %v235_v5  ;;  %264 = vmatprep.subr.bf16.mxu1 %v235_v5  ;;  %v247_v16 = vpack.c.bf16 %v31_v15, %v30_v14  ;;  %v251_v19 = vpack.c.bf16 %v33_v18, %v32_v17  ;;  %v34_v20 = vld [vmem:[%s398_s1 + $0x60] sm:$0xff]  ;;  %v36_v23 = vld [vmem:[%s398_s1 + $0x70] sm:$0xff]  ;;  %v37_v24 = vld [vmem:[%s398_s1 + $0x78] sm:$0xff] }
   0x7   :  { %219 = vmatprep.mubr.f32.mxu0 %v14_v9  ;;  %225 = vmatprep.mubr.f32.mxu1 %v18_v10  ;;  %v255_v22 = vpack.c.bf16 %v35_v21, %v34_v20  ;;  %v259_v25 = vpack.c.bf16 %v37_v24, %v36_v23  ;;  %v15_v26 = vld [vmem:[%s399_s0 + $0x8] sm:$0xff]  ;;  %v16_v28 = vld [vmem:[%s399_s0 + $0x10] sm:$0xff]  ;;  %v17_v30 = vld [vmem:[%s399_s0 + $0x18] sm:$0xff] }
   0x8   :  { %v19_v27 = vld [vmem:[%s399_s0 + $0x28] sm:$0xff]  ;;  %v20_v29 = vld [vmem:[%s399_s0 + $0x30] sm:$0xff]  ;;  %v21_v31 = vld [vmem:[%s399_s0 + $0x38] sm:$0xff] }
   0x9   :  { %238 = vmatpush3.bf16.msra.mxu0 %v235_v5  ;;  %272 = vmatpush3.bf16.msra.mxu1 %v235_v5  ;;  %v162_v32 = vld [vmem:[%s400_s2] ss:$0 sm:$0xff] }
   0xa   :  { %240 = vmatprep.subr.bf16.mxu0 %v239_v8  ;;  %265 = vmatprep.subr.bf16.mxu1 %v239_v8 }
   0xd   :  { %242 = vmatpush3.bf16.msra.mxu0 %v239_v8  ;;  %273 = vmatpush3.bf16.msra.mxu1 %v239_v8 }
   0xe   :  { %244 = vmatprep.subr.bf16.mxu0 %v243_v13  ;;  %266 = vmatprep.subr.bf16.mxu1 %v243_v13 }
  0x11   :  { %246 = vmatpush3.bf16.msra.mxu0 %v243_v13  ;;  %274 = vmatpush3.bf16.msra.mxu1 %v243_v13 }
  0x12   :  { %248 = vmatprep.subr.bf16.mxu0 %v247_v16  ;;  %267 = vmatprep.subr.bf16.mxu1 %v247_v16 }
  0x15   :  { %250 = vmatpush3.bf16.msra.mxu0 %v247_v16  ;;  %275 = vmatpush3.bf16.msra.mxu1 %v247_v16 }
  0x16   :  { %252 = vmatprep.subr.bf16.mxu0 %v251_v19  ;;  %268 = vmatprep.subr.bf16.mxu1 %v251_v19 }
  0x19   :  { %254 = vmatpush3.bf16.msra.mxu0 %v251_v19  ;;  %276 = vmatpush3.bf16.msra.mxu1 %v251_v19 }
  0x1a   :  { %256 = vmatprep.subr.bf16.mxu0 %v255_v22  ;;  %269 = vmatprep.subr.bf16.mxu1 %v255_v22 }
  0x1d   :  { %258 = vmatpush3.bf16.msra.mxu0 %v255_v22  ;;  %277 = vmatpush3.bf16.msra.mxu1 %v255_v22 }
  0x1e   :  { %260 = vmatprep.subr.bf16.mxu0 %v259_v25  ;;  %270 = vmatprep.subr.bf16.mxu1 %v259_v25 }
  0x21   :  { %262 = vmatpush3.bf16.msra.mxu0 %v259_v25  ;;  %278 = vmatpush3.bf16.msra.mxu1 %v259_v25 }
  0x24   :  { %220 = vmatmul.mubr.f32.vlgmr.msra.gmra.mrb[0].mxu0 %v15_v26  ;;  %226 = vmatmul.mubr.f32.vlgmr.msra.gmra.mrb[0].mxu1 %v19_v27 }
  0x25   :  { %222 = vmatprep.mubr.f32.mxu0 %v16_v28  ;;  %228 = vmatprep.mubr.f32.mxu1 %v20_v29 }
  0x28   :  { %223 = vmatmul.mubr.f32.gmra.mrb[2].mxu0 %v17_v30  ;;  %229 = vmatmul.mubr.f32.gmra.mrb[2].mxu1 %v21_v31 }
  0xf7   :  { %v221_v33 = vpop.f32.mrb[0].mxu0  ;;  %v227_v34 = vpop.f32.mrb[0].mxu1 }
  0xf8   :  { %v117_v35 = vadd.f32 %v221_v33, %v162_v32  ;;  %v137_v36 = vadd.f32 %v227_v34, %v162_v32  ;;  %v111_v37 = vpop.f32.mrb[1].mxu0  ;;  %v131_v38 = vpop.f32.mrb[1].mxu1 }
  0xf9   :  { %v112_v39 = vadd.f32 %v162_v32, %v111_v37  ;;  %v132_v40 = vadd.f32 %v162_v32, %v131_v38 }
  0xfa   :  { %151 = vst [vmem:[%s401_s3 + $0x8] sm:$0xff] %v117_v35  ;;  %155 = vst [vmem:[%s401_s3 + $0x28] sm:$0xff] %v137_v36 }
  0xfb   :  { %150 = vst [vmem:[%s401_s3] sm:$0xff] %v112_v39  ;;  %154 = vst [vmem:[%s401_s3 + $0x20] sm:$0xff] %v132_v40  ;;  %v224_v41 = vpop.f32.mrb[2].mxu0  ;;  %v230_v42 = vpop.f32.mrb[2].mxu1 }
  0xfc   :  { %v127_v43 = vadd.f32 %v224_v41, %v162_v32  ;;  %v147_v44 = vadd.f32 %v230_v42, %v162_v32  ;;  %v121_v45 = vpop.f32.mrb[3].mxu0  ;;  %v141_v46 = vpop.f32.mrb[3].mxu1 }
  0xfd   :  { %v122_v47 = vadd.f32 %v162_v32, %v121_v45  ;;  %v142_v48 = vadd.f32 %v162_v32, %v141_v46 }
  0xfe   :  { %153 = vst [vmem:[%s401_s3 + $0x18] sm:$0xff] %v127_v43  ;;  %157 = vst [vmem:[%s401_s3 + $0x38] sm:$0xff] %v147_v44 }
  0xff   :  { %152 = vst [vmem:[%s401_s3 + $0x10] sm:$0xff] %v122_v47  ;;  %156 = vst [vmem:[%s401_s3 + $0x30] sm:$0xff] %v142_v48 }

// kernel: text_generation_lstm_forward.5
= control target key start
LH: loop header
LB: loop body
LE: loop exit
PB: predicated region body
PF: predicated region fallthrough
CT: control target
= control target key end

     0   :  { %v435_v3 = vmov 0.0   ;;  %s827_s1 = inlined_call_operand.vmem [shape: f32[128,512], index: 1, kind: input, shape index: {}]   ;;  %s828_s0 = inlined_call_operand.vmem [shape: f32[64,128], index: 0, kind: input, shape index: {}]   ;;  %s829_s2 = inlined_call_operand.vmem [shape: f32[1,512], index: 2, kind: input, shape index: {}]   ;;  %s830_s3 = inlined_call_operand.vmem [shape: f32[64,512], index: 3, kind: output, shape index: {}]  }
   0x1   :  { %v23_v0 = vld [vmem:[%s827_s1 + $0x8] sm:$0xff]  ;;  %v25_v2 = vld [vmem:[%s827_s1 + $0x18] sm:$0xff]  ;;  %172 = vmatprep.mubr.f32.mxu0 %v435_v3  ;;  %285 = vmatprep.mubr.f32.mxu1 %v435_v3  ;;  %v22_v6 = vld [vmem:[%s827_s1] sm:$0xff] }
   0x2   :  { %v27_v1 = vld [vmem:[%s827_s1 + $0x28] sm:$0xff]  ;;  %v29_v5 = vld [vmem:[%s827_s1 + $0x38] sm:$0xff]  ;;  %v26_v7 = vld [vmem:[%s827_s1 + $0x20] sm:$0xff] }
   0x3   :  { %v370_v4 = vpack.c.bf16 %v27_v1, %v23_v0  ;;  %v402_v8 = vpack.c.bf16 %v29_v5, %v25_v2  ;;  %v372_v9 = vpack.c.bf16 %v26_v7, %v22_v6  ;;  %v24_v10 = vld [vmem:[%s827_s1 + $0x10] sm:$0xff]  ;;  %v31_v12 = vld [vmem:[%s827_s1 + $0x48] sm:$0xff]  ;;  %v33_v15 = vld [vmem:[%s827_s1 + $0x58] sm:$0xff] }
   0x4   :  { %v28_v11 = vld [vmem:[%s827_s1 + $0x30] sm:$0xff]  ;;  %v35_v14 = vld [vmem:[%s827_s1 + $0x68] sm:$0xff]  ;;  %v37_v16 = vld [vmem:[%s827_s1 + $0x78] sm:$0xff] }
   0x5   :  { %371 = vmatprep.subr.bf16.mxu0 %v370_v4  ;;  %v404_v13 = vpack.c.bf16 %v28_v11, %v24_v10  ;;  %403 = vmatprep.subr.bf16.mxu1 %v402_v8  ;;  %v374_v17 = vpack.c.bf16 %v35_v14, %v31_v12  ;;  %v406_v18 = vpack.c.bf16 %v37_v16, %v33_v15  ;;  %v30_v19 = vld [vmem:[%s827_s1 + $0x40] sm:$0xff]  ;;  %v32_v21 = vld [vmem:[%s827_s1 + $0x50] sm:$0xff]  ;;  %v39_v24 = vld [vmem:[%s827_s1 + $0x88] sm:$0xff] }
   0x6   :  { %373 = vmatpush1.bf16.msra.mxu0 %v372_v9  ;;  %v34_v20 = vld [vmem:[%s827_s1 + $0x60] sm:$0xff]  ;;  %v36_v23 = vld [vmem:[%s827_s1 + $0x70] sm:$0xff]  ;;  %v43_v25 = vld [vmem:[%s827_s1 + $0xa8] sm:$0xff] }
   0x7   :  { %405 = vmatpush1.bf16.msra.mxu1 %v404_v13  ;;  %v376_v22 = vpack.c.bf16 %v34_v20, %v30_v19  ;;  %375 = vmatprep.subr.bf16.mxu0 %v374_v17  ;;  %v408_v26 = vpack.c.bf16 %v36_v23, %v32_v21  ;;  %v378_v27 = vpack.c.bf16 %v43_v25, %v39_v24  ;;  %v41_v28 = vld [vmem:[%s827_s1 + $0x98] sm:$0xff]  ;;  %v38_v30 = vld [vmem:[%s827_s1 + $0x80] sm:$0xff]  ;;  %v40_v33 = vld [vmem:[%s827_s1 + $0x90] sm:$0xff] }
   0x8   :  { %407 = vmatprep.subr.bf16.mxu1 %v406_v18  ;;  %v45_v29 = vld [vmem:[%s827_s1 + $0xb8] sm:$0xff]  ;;  %v42_v32 = vld [vmem:[%s827_s1 + $0xa0] sm:$0xff]  ;;  %v44_v34 = vld [vmem:[%s827_s1 + $0xb0] sm:$0xff] }
   0x9   :  { %v410_v31 = vpack.c.bf16 %v45_v29, %v41_v28  ;;  %v380_v35 = vpack.c.bf16 %v42_v32, %v38_v30  ;;  %v47_v36 = vld [vmem:[%s827_s1 + $0xc8] sm:$0xff]  ;;  %v49_v38 = vld [vmem:[%s827_s1 + $0xd8] sm:$0xff]  ;;  %v412_v39 = vpack.c.bf16 %v44_v34, %v40_v33  ;;  %v46_v42 = vld [vmem:[%s827_s1 + $0xc0] sm:$0xff] }
   0xa   :  { %377 = vmatpush1.bf16.msra.mxu0 %v376_v22  ;;  %v51_v37 = vld [vmem:[%s827_s1 + $0xe8] sm:$0xff]  ;;  %v53_v41 = vld [vmem:[%s827_s1 + $0xf8] sm:$0xff]  ;;  %v50_v43 = vld [vmem:[%s827_s1 + $0xe0] sm:$0xff] }
   0xb   :  { %409 = vmatpush1.bf16.msra.mxu1 %v408_v26  ;;  %379 = vmatprep.subr.bf16.mxu0 %v378_v27  ;;  %v382_v40 = vpack.c.bf16 %v51_v37, %v47_v36  ;;  %v414_v44 = vpack.c.bf16 %v53_v41, %v49_v38  ;;  %v48_v45 = vld [vmem:[%s827_s1 + $0xd0] sm:$0xff]  ;;  %v55_v47 = vld [vmem:[%s827_s1 + $0x108] sm:$0xff]  ;;  %v57_v49 = vld [vmem:[%s827_s1 + $0x118] sm:$0xff]  ;;  %v384_v51 = vpack.c.bf16 %v50_v43, %v46_v42  ;;  %v88_v42 = vlaneseq }
   0xc   :  { %411 = vmatprep.subr.bf16.mxu1 %v410_v31  ;;  %v52_v46 = vld [vmem:[%s827_s1 + $0xf0] sm:$0xff]  ;;  %v59_v48 = vld [vmem:[%s827_s1 + $0x128] sm:$0xff]  ;;  %v61_v50 = vld [vmem:[%s827_s1 + $0x138] sm:$0xff] }
   0xd   :  { %v416_v52 = vpack.c.bf16 %v52_v46, %v48_v45  ;;  %v386_v53 = vpack.c.bf16 %v59_v48, %v55_v47  ;;  %v54_v54 = vld [vmem:[%s827_s1 + $0x100] sm:$0xff]  ;;  %v56_v56 = vld [vmem:[%s827_s1 + $0x110] sm:$0xff]  ;;  %v418_v57 = vpack.c.bf16 %v61_v50, %v57_v49  ;;  %v63_v59 = vld [vmem:[%s827_s1 + $0x148] sm:$0xff]  ;;  %v89_v43 = vshrl.u32 %v88_v42, 7 }
   0xe   :  { %381 = vmatpush1.bf16.msra.mxu0 %v380_v35  ;;  %v58_v55 = vld [vmem:[%s827_s1 + $0x120] sm:$0xff]  ;;  %v60_v58 = vld [vmem:[%s827_s1 + $0x130] sm:$0xff]  ;;  %v67_v60 = vld [vmem:[%s827_s1 + $0x168] sm:$0xff] }
   0xf   :  { %413 = vmatpush1.bf16.msra.mxu1 %v412_v39  ;;  %383 = vmatprep.subr.bf16.mxu0 %v382_v40  ;;  %v65_v61 = vld [vmem:[%s827_s1 + $0x158] sm:$0xff]  ;;  %v388_v63 = vpack.c.bf16 %v58_v55, %v54_v54  ;;  %v420_v0 = vpack.c.bf16 %v60_v58, %v56_v56  ;;  %v390_v1 = vpack.c.bf16 %v67_v60, %v63_v59  ;;  %v62_v2 = vld [vmem:[%s827_s1 + $0x140] sm:$0xff]  ;;  %v64_v5 = vld [vmem:[%s827_s1 + $0x150] sm:$0xff]  ;;  %v98_v46 = vsub.s32 2, %v89_v43 }
  0x10   :  { %415 = vmatprep.subr.bf16.mxu1 %v414_v44  ;;  %v69_v62 = vld [vmem:[%s827_s1 + $0x178] sm:$0xff]  ;;  %v66_v4 = vld [vmem:[%s827_s1 + $0x160] sm:$0xff]  ;;  %v68_v7 = vld [vmem:[%s827_s1 + $0x170] sm:$0xff]  ;;  %v90_v44 = vsub.s32 0, %v89_v43  ;;  %v94_v47 = vsub.s32 1, %v89_v43  ;;  %v102_v48 = vsub.s32 3, %v89_v43 }
  0x11   :  { %v422_v6 = vpack.c.bf16 %v69_v62, %v65_v61  ;;  %v71_v8 = vld [vmem:[%s827_s1 + $0x188] sm:$0xff]  ;;  %v73_v10 = vld [vmem:[%s827_s1 + $0x198] sm:$0xff]  ;;  %v392_v12 = vpack.c.bf16 %v66_v4, %v62_v2  ;;  %v424_v13 = vpack.c.bf16 %v68_v7, %v64_v5  ;;  %v70_v15 = vld [vmem:[%s827_s1 + $0x180] sm:$0xff] }
  0x12   :  { %385 = vmatpush1.bf16.msra.mxu0 %v384_v51  ;;  %v75_v9 = vld [vmem:[%s827_s1 + $0x1a8] sm:$0xff]  ;;  %v77_v11 = vld [vmem:[%s827_s1 + $0x1b8] sm:$0xff]  ;;  %v74_v16 = vld [vmem:[%s827_s1 + $0x1a0] sm:$0xff] }
  0x13   :  { %417 = vmatpush1.bf16.msra.mxu1 %v416_v52  ;;  %387 = vmatprep.subr.bf16.mxu0 %v386_v53  ;;  %v394_v14 = vpack.c.bf16 %v75_v9, %v71_v8  ;;  %v72_v17 = vld [vmem:[%s827_s1 + $0x190] sm:$0xff]  ;;  %v426_v18 = vpack.c.bf16 %v77_v11, %v73_v10  ;;  %v79_v20 = vld [vmem:[%s827_s1 + $0x1c8] sm:$0xff]  ;;  %v81_v22 = vld [vmem:[%s827_s1 + $0x1d8] sm:$0xff]  ;;  %v396_v24 = vpack.c.bf16 %v74_v16, %v70_v15 }
  0x14   :  { %419 = vmatprep.subr.bf16.mxu1 %v418_v57  ;;  %v76_v19 = vld [vmem:[%s827_s1 + $0x1b0] sm:$0xff]  ;;  %v83_v21 = vld [vmem:[%s827_s1 + $0x1e8] sm:$0xff]  ;;  %v85_v23 = vld [vmem:[%s827_s1 + $0x1f8] sm:$0xff] }
  0x15   :  { %v428_v25 = vpack.c.bf16 %v76_v19, %v72_v17  ;;  %v398_v26 = vpack.c.bf16 %v83_v21, %v79_v20  ;;  %v78_v27 = vld [vmem:[%s827_s1 + $0x1c0] sm:$0xff]  ;;  %v430_v29 = vpack.c.bf16 %v85_v23, %v81_v22  ;;  %v80_v30 = vld [vmem:[%s827_s1 + $0x1d0] sm:$0xff]  ;;  %v15_v35 = vld [vmem:[%s828_s0 + $0x8] sm:$0xff] }
  0x16   :  { %389 = vmatpush1.bf16.msra.mxu0 %v388_v63  ;;  %v82_v28 = vld [vmem:[%s827_s1 + $0x1e0] sm:$0xff]  ;;  %v84_v31 = vld [vmem:[%s827_s1 + $0x1f0] sm:$0xff]  ;;  %v17_v37 = vld [vmem:[%s828_s0 + $0x18] sm:$0xff] }
  0x17   :  { %421 = vmatpush1.bf16.msra.mxu1 %v420_v0  ;;  %391 = vmatprep.subr.bf16.mxu0 %v390_v1  ;;  %v400_v32 = vpack.c.bf16 %v82_v28, %v78_v27  ;;  %v432_v33 = vpack.c.bf16 %v84_v31, %v80_v30  ;;  %v14_v34 = vld [vmem:[%s828_s0] sm:$0xff]  ;;  %v16_v36 = vld [vmem:[%s828_s0 + $0x10] sm:$0xff]  ;;  %v19_v39 = vld [vmem:[%s828_s0 + $0x28] sm:$0xff] }
  0x18   :  { %423 = vmatprep.subr.bf16.mxu1 %v422_v6  ;;  %v18_v38 = vld [vmem:[%s828_s0 + $0x20] sm:$0xff]  ;;  %v20_v40 = vld [vmem:[%s828_s0 + $0x30] sm:$0xff]  ;;  %v21_v41 = vld [vmem:[%s828_s0 + $0x38] sm:$0xff] }
  0x19   :  { %v86_v45 = vld [vmem:[%s829_s2] sm:$0xf] }
  0x1a   :  { %393 = vmatpush1.bf16.msra.mxu0 %v392_v12  ;;  %v691_v49 = vrot.slane %v86_v45, %v90_v44  ;;  %v693_v50 = vrot.slane %v86_v45, %v98_v46  ;;  %v695_v51 = vrot.slane %v86_v45, %v94_v47  ;;  %v697_v52 = vrot.slane %v86_v45, %v102_v48 }
  0x1b   :  { %425 = vmatpush1.bf16.msra.mxu1 %v424_v13  ;;  %395 = vmatprep.subr.bf16.mxu0 %v394_v14 }
  0x1c   :  { %427 = vmatprep.subr.bf16.mxu1 %v426_v18 }
  0x1e   :  { %397 = vmatpush1.bf16.msra.mxu0 %v396_v24 }
  0x1f   :  { %429 = vmatpush1.bf16.msra.mxu1 %v428_v25  ;;  %399 = vmatprep.subr.bf16.mxu0 %v398_v26 }
  0x20   :  { %431 = vmatprep.subr.bf16.mxu1 %v430_v29 }
  0x22   :  { %401 = vmatpush1.bf16.msra.mxu0 %v400_v32 }
  0x23   :  { %433 = vmatpush1.bf16.msra.mxu1 %v432_v33 }
  0x25   :  { %173 = vmatmul.mubr.f32.vlgmr.msra.gmra.mrb[0].mxu0 %v14_v34 }
  0x26   :  { %286 = vmatmul.mubr.f32.vlgmr.msra.gmra.mrb[0].mxu1 %v14_v34  ;;  %178 = vmatprep.mubr.f32.mxu0 %v435_v3 }
  0x27   :  { %291 = vmatprep.mubr.f32.mxu1 %v435_v3 }
  0x29   :  { %179 = vmatmul.mubr.f32.gmra.mrb[2].mxu0 %v15_v35 }
  0x2a   :  { %292 = vmatmul.mubr.f32.gmra.mrb[2].mxu1 %v15_v35  ;;  %184 = vmatprep.mubr.f32.mxu0 %v435_v3 }
  0x2b   :  { %297 = vmatprep.mubr.f32.mxu1 %v435_v3 }
  0x2d   :  { %185 = vmatmul.mubr.f32.gmra.mrb[4].mxu0 %v16_v36 }
  0x2e   :  { %298 = vmatmul.mubr.f32.gmra.mrb[4].mxu1 %v16_v36  ;;  %190 = vmatprep.mubr.f32.mxu0 %v435_v3 }
  0x2f   :  { %303 = vmatprep.mubr.f32.mxu1 %v435_v3 }
  0x31   :  { %191 = vmatmul.mubr.f32.gmra.mrb[6].mxu0 %v17_v37 }
  0x32   :  { %304 = vmatmul.mubr.f32.gmra.mrb[6].mxu1 %v17_v37  ;;  %196 = vmatprep.mubr.f32.mxu0 %v435_v3 }
  0x33   :  { %309 = vmatprep.mubr.f32.mxu1 %v435_v3 }
  0x35   :  { %197 = vmatmul.mubr.f32.gmra.mrb[8].mxu0 %v18_v38 }
  0x36   :  { %310 = vmatmul.mubr.f32.gmra.mrb[8].mxu1 %v18_v38  ;;  %202 = vmatprep.mubr.f32.mxu0 %v435_v3 }
  0x37   :  { %315 = vmatprep.mubr.f32.mxu1 %v435_v3 }
  0x39   :  { %203 = vmatmul.mubr.f32.gmra.mrb[10].mxu0 %v19_v39 }
  0x3a   :  { %316 = vmatmul.mubr.f32.gmra.mrb[10].mxu1 %v19_v39  ;;  %208 = vmatprep.mubr.f32.mxu0 %v435_v3 }
  0x3b   :  { %321 = vmatprep.mubr.f32.mxu1 %v435_v3 }
  0x3d   :  { %209 = vmatmul.mubr.f32.gmra.mrb[12].mxu0 %v20_v40 }
  0x3e   :  { %322 = vmatmul.mubr.f32.gmra.mrb[12].mxu1 %v20_v40  ;;  %214 = vmatprep.mubr.f32.mxu0 %v435_v3 }
  0x3f   :  { %327 = vmatprep.mubr.f32.mxu1 %v435_v3 }
  0x41   :  { %215 = vmatmul.mubr.f32.gmra.mrb[14].mxu0 %v21_v41 }
  0x42   :  { %328 = vmatmul.mubr.f32.gmra.mrb[14].mxu1 %v21_v41 }
  0xf8   :  { %v174_v3 = vpop.f32.mrb[0].mxu0 }
  0xf9   :  { %v175_v53 = vadd.f32 %v174_v3, %v691_v49  ;;  %v287_v54 = vpop.f32.mrb[0].mxu1  ;;  %v176_v55 = vpop.f32.mrb[1].mxu0 }
  0xfa   :  { %v288_v56 = vadd.f32 %v287_v54, %v693_v50  ;;  %v177_v57 = vadd.f32 %v176_v55, %v695_v51  ;;  %v289_v58 = vpop.f32.mrb[1].mxu1 }
  0xfb   :  { %334 = vst [vmem:[%s830_s3] sm:$0xff] %v175_v53  ;;  %v290_v59 = vadd.f32 %v289_v58, %v697_v52 }
  0xfc   :  { %336 = vst [vmem:[%s830_s3 + $0x10] sm:$0xff] %v288_v56  ;;  %335 = vst [vmem:[%s830_s3 + $0x8] sm:$0xff] %v177_v57  ;;  %v180_v60 = vpop.f32.mrb[2].mxu0 }
  0xfd   :  { %337 = vst [vmem:[%s830_s3 + $0x18] sm:$0xff] %v290_v59  ;;  %v181_v61 = vadd.f32 %v180_v60, %v691_v49  ;;  %v293_v62 = vpop.f32.mrb[2].mxu1  ;;  %v182_v63 = vpop.f32.mrb[3].mxu0 }
  0xfe   :  { %v294_v0 = vadd.f32 %v293_v62, %v693_v50  ;;  %v183_v1 = vadd.f32 %v182_v63, %v695_v51  ;;  %v295_v2 = vpop.f32.mrb[3].mxu1 }
  0xff   :  { %338 = vst [vmem:[%s830_s3 + $0x20] sm:$0xff] %v181_v61  ;;  %v296_v4 = vadd.f32 %v295_v2, %v697_v52 }
 0x100   :  { %340 = vst [vmem:[%s830_s3 + $0x30] sm:$0xff] %v294_v0  ;;  %339 = vst [vmem:[%s830_s3 + $0x28] sm:$0xff] %v183_v1  ;;  %v186_v5 = vpop.f32.mrb[4].mxu0 }
 0x101   :  { %341 = vst [vmem:[%s830_s3 + $0x38] sm:$0xff] %v296_v4  ;;  %v187_v6 = vadd.f32 %v186_v5, %v691_v49  ;;  %v299_v7 = vpop.f32.mrb[4].mxu1  ;;  %v188_v8 = vpop.f32.mrb[5].mxu0 }
 0x102   :  { %v300_v9 = vadd.f32 %v299_v7, %v693_v50  ;;  %v189_v10 = vadd.f32 %v188_v8, %v695_v51  ;;  %v301_v11 = vpop.f32.mrb[5].mxu1 }
 0x103   :  { %342 = vst [vmem:[%s830_s3 + $0x40] sm:$0xff] %v187_v6  ;;  %v302_v12 = vadd.f32 %v301_v11, %v697_v52 }
 0x104   :  { %344 = vst [vmem:[%s830_s3 + $0x50] sm:$0xff] %v300_v9  ;;  %343 = vst [vmem:[%s830_s3 + $0x48] sm:$0xff] %v189_v10  ;;  %v192_v13 = vpop.f32.mrb[6].mxu0 }
 0x105   :  { %345 = vst [vmem:[%s830_s3 + $0x58] sm:$0xff] %v302_v12  ;;  %v193_v14 = vadd.f32 %v192_v13, %v691_v49  ;;  %v305_v15 = vpop.f32.mrb[6].mxu1  ;;  %v194_v16 = vpop.f32.mrb[7].mxu0 }
 0x106   :  { %v306_v17 = vadd.f32 %v305_v15, %v693_v50  ;;  %v195_v18 = vadd.f32 %v194_v16, %v695_v51  ;;  %v307_v19 = vpop.f32.mrb[7].mxu1 }
 0x107   :  { %346 = vst [vmem:[%s830_s3 + $0x60] sm:$0xff] %v193_v14  ;;  %v308_v20 = vadd.f32 %v307_v19, %v697_v52 }
 0x108   :  { %348 = vst [vmem:[%s830_s3 + $0x70] sm:$0xff] %v306_v17  ;;  %347 = vst [vmem:[%s830_s3 + $0x68] sm:$0xff] %v195_v18  ;;  %v198_v21 = vpop.f32.mrb[8].mxu0 }
 0x109   :  { %349 = vst [vmem:[%s830_s3 + $0x78] sm:$0xff] %v308_v20  ;;  %v199_v22 = vadd.f32 %v198_v21, %v691_v49  ;;  %v311_v23 = vpop.f32.mrb[8].mxu1  ;;  %v200_v24 = vpop.f32.mrb[9].mxu0 }
 0x10a   :  { %v312_v25 = vadd.f32 %v311_v23, %v693_v50  ;;  %v201_v26 = vadd.f32 %v200_v24, %v695_v51  ;;  %v313_v27 = vpop.f32.mrb[9].mxu1 }
 0x10b   :  { %350 = vst [vmem:[%s830_s3 + $0x80] sm:$0xff] %v199_v22  ;;  %v314_v28 = vadd.f32 %v313_v27, %v697_v52 }
 0x10c   :  { %352 = vst [vmem:[%s830_s3 + $0x90] sm:$0xff] %v312_v25  ;;  %351 = vst [vmem:[%s830_s3 + $0x88] sm:$0xff] %v201_v26  ;;  %v204_v29 = vpop.f32.mrb[10].mxu0 }
 0x10d   :  { %353 = vst [vmem:[%s830_s3 + $0x98] sm:$0xff] %v314_v28  ;;  %v205_v30 = vadd.f32 %v204_v29, %v691_v49  ;;  %v317_v31 = vpop.f32.mrb[10].mxu1  ;;  %v206_v32 = vpop.f32.mrb[11].mxu0 }
 0x10e   :  { %v318_v33 = vadd.f32 %v317_v31, %v693_v50  ;;  %v207_v34 = vadd.f32 %v206_v32, %v695_v51  ;;  %v319_v35 = vpop.f32.mrb[11].mxu1 }
 0x10f   :  { %354 = vst [vmem:[%s830_s3 + $0xa0] sm:$0xff] %v205_v30  ;;  %v320_v36 = vadd.f32 %v319_v35, %v697_v52 }
 0x110   :  { %356 = vst [vmem:[%s830_s3 + $0xb0] sm:$0xff] %v318_v33  ;;  %355 = vst [vmem:[%s830_s3 + $0xa8] sm:$0xff] %v207_v34  ;;  %v210_v37 = vpop.f32.mrb[12].mxu0 }
 0x111   :  { %357 = vst [vmem:[%s830_s3 + $0xb8] sm:$0xff] %v320_v36  ;;  %v211_v38 = vadd.f32 %v210_v37, %v691_v49  ;;  %v323_v39 = vpop.f32.mrb[12].mxu1  ;;  %v212_v40 = vpop.f32.mrb[13].mxu0 }
 0x112   :  { %v324_v41 = vadd.f32 %v323_v39, %v693_v50  ;;  %v213_v42 = vadd.f32 %v212_v40, %v695_v51  ;;  %v325_v43 = vpop.f32.mrb[13].mxu1 }
 0x113   :  { %358 = vst [vmem:[%s830_s3 + $0xc0] sm:$0xff] %v211_v38  ;;  %v326_v44 = vadd.f32 %v325_v43, %v697_v52 }
 0x114   :  { %360 = vst [vmem:[%s830_s3 + $0xd0] sm:$0xff] %v324_v41  ;;  %359 = vst [vmem:[%s830_s3 + $0xc8] sm:$0xff] %v213_v42  ;;  %v216_v45 = vpop.f32.mrb[14].mxu0 }
 0x115   :  { %361 = vst [vmem:[%s830_s3 + $0xd8] sm:$0xff] %v326_v44  ;;  %v217_v46 = vadd.f32 %v216_v45, %v691_v49  ;;  %v329_v47 = vpop.f32.mrb[14].mxu1  ;;  %v218_v48 = vpop.f32.mrb[15].mxu0 }
 0x116   :  { %v330_v3 = vadd.f32 %v329_v47, %v693_v50  ;;  %v219_v53 = vadd.f32 %v218_v48, %v695_v51  ;;  %v331_v54 = vpop.f32.mrb[15].mxu1 }
 0x117   :  { %362 = vst [vmem:[%s830_s3 + $0xe0] sm:$0xff] %v217_v46  ;;  %v332_v55 = vadd.f32 %v331_v54, %v697_v52 }
 0x118   :  { %364 = vst [vmem:[%s830_s3 + $0xf0] sm:$0xff] %v330_v3  ;;  %363 = vst [vmem:[%s830_s3 + $0xe8] sm:$0xff] %v219_v53 }
 0x119   :  { %365 = vst [vmem:[%s830_s3 + $0xf8] sm:$0xff] %v332_v55 }

// kernel: text_generation_lstm_forward.6
= control target key start
LH: loop header
LB: loop body
LE: loop exit
PB: predicated region body
PF: predicated region fallthrough
CT: control target
= control target key end

     0   :  { %v2257_v3 = vmov 0.0   ;;  %s2977_s3 = inlined_call_operand.vmem [shape: f32[128,512], index: 3, kind: input, shape index: {}]   ;;  %s2978_s1 = inlined_call_operand.vmem [shape: f32[8,128], index: 1, kind: input, shape index: {}]   ;;  %s2979_s0 = inlined_call_operand.vmem [shape: f32[8,8,512], index: 0, kind: input, shape index: {}]   ;;  %s2980_s2 = inlined_call_operand.vmem [shape: f32[8,128], index: 2, kind: input, shape index: {}]   ;;  %s2981_s4 = inlined_call_operand.vmem [shape: f32[8,8,128], index: 4, kind: output, shape index: {0}]   ;;  %s2982_s6 = inlined_call_operand.vmem [shape: f32[8,128], index: 6, kind: output, shape index: {2}]   ;;  %s2983_s5 = inlined_call_operand.vmem [shape: f32[8,128], index: 5, kind: output, shape index: {1}]  }
   0x1   :  { %v29_v0 = vld [vmem:[%s2977_s3 + $0x8] sm:$0xff]  ;;  %v28_v2 = vld [vmem:[%s2977_s3] sm:$0xff]  ;;  %162 = vmatprep.mubr.f32.mxu0 %v2257_v3  ;;  %233 = vmatprep.mubr.f32.mxu1 %v2257_v3  ;;  %v31_v19 = vld [vmem:[%s2977_s3 + $0x18] sm:$0xff] }
   0x2   :  { %v33_v1 = vld [vmem:[%s2977_s3 + $0x28] sm:$0xff]  ;;  %v32_v5 = vld [vmem:[%s2977_s3 + $0x20] sm:$0xff]  ;;  %v35_v20 = vld [vmem:[%s2977_s3 + $0x38] sm:$0xff] }
   0x3   :  { %v2304_v4 = vpack.c.bf16 %v33_v1, %v29_v0  ;;  %v37_v6 = vld [vmem:[%s2977_s3 + $0x48] sm:$0xff]  ;;  %v2315_v8 = vpack.c.bf16 %v32_v5, %v28_v2  ;;  %v36_v10 = vld [vmem:[%s2977_s3 + $0x40] sm:$0xff]  ;;  %v2356_v22 = vpack.c.bf16 %v35_v20, %v31_v19  ;;  %v30_v23 = vld [vmem:[%s2977_s3 + $0x10] sm:$0xff] }
   0x4   :  { %v41_v7 = vld [vmem:[%s2977_s3 + $0x68] sm:$0xff]  ;;  %v40_v11 = vld [vmem:[%s2977_s3 + $0x60] sm:$0xff]  ;;  %v34_v24 = vld [vmem:[%s2977_s3 + $0x30] sm:$0xff] }
   0x5   :  { %v2317_v9 = vpack.c.bf16 %v41_v7, %v37_v6  ;;  %v45_v12 = vld [vmem:[%s2977_s3 + $0x88] sm:$0xff]  ;;  %1617 = vmatprep.subr.bf16.mxu0 %v2304_v4  ;;  %v2333_v14 = vpack.c.bf16 %v40_v11, %v36_v10  ;;  %v44_v15 = vld [vmem:[%s2977_s3 + $0x80] sm:$0xff]  ;;  %v2364_v25 = vpack.c.bf16 %v34_v24, %v30_v23  ;;  %1649 = vmatprep.subr.bf16.mxu1 %v2356_v22  ;;  %v39_v27 = vld [vmem:[%s2977_s3 + $0x58] sm:$0xff] }
   0x6   :  { %v49_v13 = vld [vmem:[%s2977_s3 + $0xa8] sm:$0xff]  ;;  %1619 = vmatpush1.bf16.msra.mxu0 %v2315_v8  ;;  %v48_v16 = vld [vmem:[%s2977_s3 + $0xa0] sm:$0xff]  ;;  %v43_v28 = vld [vmem:[%s2977_s3 + $0x78] sm:$0xff] }
   0x7   :  { %1621 = vmatprep.subr.bf16.mxu0 %v2317_v9  ;;  %v2342_v17 = vpack.c.bf16 %v49_v13, %v45_v12  ;;  %v53_v18 = vld [vmem:[%s2977_s3 + $0xc8] sm:$0xff]  ;;  %v2367_v26 = vpack.c.bf16 %v48_v16, %v44_v15  ;;  %v38_v29 = vld [vmem:[%s2977_s3 + $0x50] sm:$0xff]  ;;  %v52_v31 = vld [vmem:[%s2977_s3 + $0xc0] sm:$0xff]  ;;  %1651 = vmatpush1.bf16.msra.mxu1 %v2364_v25  ;;  %v2389_v33 = vpack.c.bf16 %v43_v28, %v39_v27 }
   0x8   :  { %v57_v21 = vld [vmem:[%s2977_s3 + $0xe8] sm:$0xff]  ;;  %v56_v32 = vld [vmem:[%s2977_s3 + $0xe0] sm:$0xff]  ;;  %v42_v34 = vld [vmem:[%s2977_s3 + $0x70] sm:$0xff] }
   0x9   :  { %v2380_v30 = vpack.c.bf16 %v57_v21, %v53_v18  ;;  %v61_v35 = vld [vmem:[%s2977_s3 + $0x108] sm:$0xff]  ;;  %v2400_v37 = vpack.c.bf16 %v42_v34, %v38_v29  ;;  %v47_v38 = vld [vmem:[%s2977_s3 + $0x98] sm:$0xff]  ;;  %1653 = vmatprep.subr.bf16.mxu1 %v2389_v33  ;;  %v46_v40 = vld [vmem:[%s2977_s3 + $0x90] sm:$0xff]  ;;  %v2416_v42 = vpack.c.bf16 %v56_v32, %v52_v31 }
   0xa   :  { %1623 = vmatpush1.bf16.msra.mxu0 %v2333_v14  ;;  %v65_v36 = vld [vmem:[%s2977_s3 + $0x128] sm:$0xff]  ;;  %v51_v39 = vld [vmem:[%s2977_s3 + $0xb8] sm:$0xff]  ;;  %v50_v41 = vld [vmem:[%s2977_s3 + $0xb0] sm:$0xff] }
   0xb   :  { %1625 = vmatprep.subr.bf16.mxu0 %v2342_v17  ;;  %v60_v43 = vld [vmem:[%s2977_s3 + $0x100] sm:$0xff]  ;;  %v2424_v45 = vpack.c.bf16 %v51_v39, %v47_v38  ;;  %v2427_v46 = vpack.c.bf16 %v65_v36, %v61_v35  ;;  %1655 = vmatpush1.bf16.msra.mxu1 %v2400_v37  ;;  %v69_v47 = vld [vmem:[%s2977_s3 + $0x148] sm:$0xff]  ;;  %v2433_v48 = vpack.c.bf16 %v50_v41, %v46_v40  ;;  %v55_v49 = vld [vmem:[%s2977_s3 + $0xd8] sm:$0xff] }
   0xc   :  { %v64_v44 = vld [vmem:[%s2977_s3 + $0x120] sm:$0xff]  ;;  %v59_v50 = vld [vmem:[%s2977_s3 + $0xf8] sm:$0xff]  ;;  %v73_v51 = vld [vmem:[%s2977_s3 + $0x168] sm:$0xff] }
   0xd   :  { %1657 = vmatprep.subr.bf16.mxu1 %v2424_v45  ;;  %v2445_v52 = vpack.c.bf16 %v59_v50, %v55_v49  ;;  %v54_v53 = vld [vmem:[%s2977_s3 + $0xd0] sm:$0xff]  ;;  %v2454_v55 = vpack.c.bf16 %v64_v44, %v60_v43  ;;  %v63_v56 = vld [vmem:[%s2977_s3 + $0x118] sm:$0xff]  ;;  %v2463_v58 = vpack.c.bf16 %v73_v51, %v69_v47  ;;  %v68_v59 = vld [vmem:[%s2977_s3 + $0x140] sm:$0xff] }
   0xe   :  { %1627 = vmatpush1.bf16.msra.mxu0 %v2367_v26  ;;  %v58_v54 = vld [vmem:[%s2977_s3 + $0xf0] sm:$0xff]  ;;  %v67_v57 = vld [vmem:[%s2977_s3 + $0x138] sm:$0xff]  ;;  %v72_v60 = vld [vmem:[%s2977_s3 + $0x160] sm:$0xff] }
   0xf   :  { %1629 = vmatprep.subr.bf16.mxu0 %v2380_v30  ;;  %1659 = vmatpush1.bf16.msra.mxu1 %v2433_v48  ;;  %v77_v61 = vld [vmem:[%s2977_s3 + $0x188] sm:$0xff]  ;;  %v2475_v62 = vpack.c.bf16 %v58_v54, %v54_v53  ;;  %v2481_v0 = vpack.c.bf16 %v67_v57, %v63_v56  ;;  %v62_v1 = vld [vmem:[%s2977_s3 + $0x110] sm:$0xff]  ;;  %v71_v5 = vld [vmem:[%s2977_s3 + $0x158] sm:$0xff]  ;;  %v2496_v7 = vpack.c.bf16 %v72_v60, %v68_v59 }
  0x10   :  { %v81_v63 = vld [vmem:[%s2977_s3 + $0x1a8] sm:$0xff]  ;;  %1661 = vmatprep.subr.bf16.mxu1 %v2445_v52  ;;  %v66_v2 = vld [vmem:[%s2977_s3 + $0x130] sm:$0xff]  ;;  %v75_v6 = vld [vmem:[%s2977_s3 + $0x178] sm:$0xff] }
  0x11   :  { %v2499_v10 = vpack.c.bf16 %v81_v63, %v77_v61  ;;  %v76_v11 = vld [vmem:[%s2977_s3 + $0x180] sm:$0xff]  ;;  %v85_v13 = vld [vmem:[%s2977_s3 + $0x1c8] sm:$0xff]  ;;  %v2511_v15 = vpack.c.bf16 %v66_v2, %v62_v1  ;;  %v2517_v18 = vpack.c.bf16 %v75_v6, %v71_v5  ;;  %v70_v19 = vld [vmem:[%s2977_s3 + $0x150] sm:$0xff] }
  0x12   :  { %1631 = vmatpush1.bf16.msra.mxu0 %v2416_v42  ;;  %v80_v12 = vld [vmem:[%s2977_s3 + $0x1a0] sm:$0xff]  ;;  %v89_v16 = vld [vmem:[%s2977_s3 + $0x1e8] sm:$0xff]  ;;  %v74_v20 = vld [vmem:[%s2977_s3 + $0x170] sm:$0xff] }
  0x13   :  { %1633 = vmatprep.subr.bf16.mxu0 %v2427_v46  ;;  %1663 = vmatpush1.bf16.msra.mxu1 %v2475_v62  ;;  %v79_v21 = vld [vmem:[%s2977_s3 + $0x198] sm:$0xff]  ;;  %v2532_v24 = vpack.c.bf16 %v80_v12, %v76_v11  ;;  %v2535_v27 = vpack.c.bf16 %v89_v16, %v85_v13  ;;  %v84_v28 = vld [vmem:[%s2977_s3 + $0x1c0] sm:$0xff]  ;;  %v2544_v31 = vpack.c.bf16 %v74_v20, %v70_v19  ;;  %v78_v34 = vld [vmem:[%s2977_s3 + $0x190] sm:$0xff] }
  0x14   :  { %1665 = vmatprep.subr.bf16.mxu1 %v2481_v0  ;;  %v83_v23 = vld [vmem:[%s2977_s3 + $0x1b8] sm:$0xff]  ;;  %v88_v29 = vld [vmem:[%s2977_s3 + $0x1e0] sm:$0xff]  ;;  %v82_v35 = vld [vmem:[%s2977_s3 + $0x1b0] sm:$0xff] }
  0x15   :  { %v2547_v32 = vpack.c.bf16 %v83_v23, %v79_v21  ;;  %v87_v36 = vld [vmem:[%s2977_s3 + $0x1d8] sm:$0xff]  ;;  %v2562_v39 = vpack.c.bf16 %v88_v29, %v84_v28  ;;  %v2566_v40 = vpack.c.bf16 %v82_v35, %v78_v34  ;;  %v86_v43 = vld [vmem:[%s2977_s3 + $0x1d0] sm:$0xff]  ;;  %v24_v47 = vld [vmem:[%s2978_s1] sm:$0xff] }
  0x16   :  { %1635 = vmatpush1.bf16.msra.mxu0 %v2454_v55  ;;  %v91_v38 = vld [vmem:[%s2977_s3 + $0x1f8] sm:$0xff]  ;;  %v90_v44 = vld [vmem:[%s2977_s3 + $0x1f0] sm:$0xff]  ;;  %v94_v50 = vld [vmem:[%s2979_s0] sm:$0xff] }
  0x17   :  { %1637 = vmatprep.subr.bf16.mxu0 %v2463_v58  ;;  %1667 = vmatpush1.bf16.msra.mxu1 %v2511_v15  ;;  %v2569_v41 = vpack.c.bf16 %v91_v38, %v87_v36  ;;  %v2582_v49 = vpack.c.bf16 %v90_v44, %v86_v43  ;;  %v95_v51 = vld [vmem:[%s2979_s0 + $0x8] sm:$0xff]  ;;  %v97_v61 = vld [vmem:[%s2979_s0 + $0x18] sm:$0xff]  ;;  %v96_v5 = vld [vmem:[%s2979_s0 + $0x10] sm:$0xff] }
  0x18   :  { %1669 = vmatprep.subr.bf16.mxu1 %v2517_v18  ;;  %v26_v23 = vld [vmem:[%s2980_s2] sm:$0xff] }
  0x1a   :  { %1639 = vmatpush1.bf16.msra.mxu0 %v2496_v7 }
  0x1b   :  { %1641 = vmatprep.subr.bf16.mxu0 %v2499_v10  ;;  %1671 = vmatpush1.bf16.msra.mxu1 %v2544_v31 }
  0x1c   :  { %1673 = vmatprep.subr.bf16.mxu1 %v2547_v32 }
  0x1e   :  { %1643 = vmatpush1.bf16.msra.mxu0 %v2532_v24 }
  0x1f   :  { %1645 = vmatprep.subr.bf16.mxu0 %v2535_v27  ;;  %1675 = vmatpush1.bf16.msra.mxu1 %v2566_v40 }
  0x20   :  { %1677 = vmatprep.subr.bf16.mxu1 %v2569_v41 }
  0x22   :  { %1647 = vmatpush1.bf16.msra.mxu0 %v2562_v39 }
  0x23   :  { %1681 = vmatprep.subr.bf16.mxu0 %v2304_v4  ;;  %1679 = vmatpush1.bf16.msra.mxu1 %v2582_v49 }
  0x24   :  { %1713 = vmatprep.subr.bf16.mxu1 %v2356_v22 }
  0x25   :  { %163 = vmatmul.mubr.f32.vlgmr.msra.gmra.mrb[0].mxu0 %v24_v47 }
  0x26   :  { %1683 = vmatpush1.bf16.msra.mxu0 %v2315_v8  ;;  %342 = vmatprep.mubr.f32.mxu0 %v2257_v3 }
  0x27   :  { %1685 = vmatprep.subr.bf16.mxu0 %v2317_v9  ;;  %234 = vmatmul.mubr.f32.vlgmr.msra.gmra.mrb[0].mxu1 %v24_v47 }
  0x28   :  { %1715 = vmatpush1.bf16.msra.mxu1 %v2364_v25  ;;  %413 = vmatprep.mubr.f32.mxu1 %v2257_v3 }
  0x29   :  { %1717 = vmatprep.subr.bf16.mxu1 %v2389_v33 }
  0x2a   :  { %1687 = vmatpush1.bf16.msra.mxu0 %v2333_v14 }
  0x2b   :  { %1689 = vmatprep.subr.bf16.mxu0 %v2342_v17 }
  0x2c   :  { %1719 = vmatpush1.bf16.msra.mxu1 %v2400_v37 }
  0x2d   :  { %1721 = vmatprep.subr.bf16.mxu1 %v2424_v45 }
  0x2e   :  { %1691 = vmatpush1.bf16.msra.mxu0 %v2367_v26 }
  0x2f   :  { %1693 = vmatprep.subr.bf16.mxu0 %v2380_v30 }
  0x30   :  { %1723 = vmatpush1.bf16.msra.mxu1 %v2433_v48 }
  0x31   :  { %1725 = vmatprep.subr.bf16.mxu1 %v2445_v52 }
  0x32   :  { %1695 = vmatpush1.bf16.msra.mxu0 %v2416_v42 }
  0x33   :  { %1697 = vmatprep.subr.bf16.mxu0 %v2427_v46 }
  0x34   :  { %1727 = vmatpush1.bf16.msra.mxu1 %v2475_v62 }
  0x35   :  { %1729 = vmatprep.subr.bf16.mxu1 %v2481_v0 }
  0x36   :  { %1699 = vmatpush1.bf16.msra.mxu0 %v2454_v55 }
  0x37   :  { %1701 = vmatprep.subr.bf16.mxu0 %v2463_v58 }
  0x38   :  { %1731 = vmatpush1.bf16.msra.mxu1 %v2511_v15 }
  0x39   :  { %1733 = vmatprep.subr.bf16.mxu1 %v2517_v18 }
  0x3a   :  { %1703 = vmatpush1.bf16.msra.mxu0 %v2496_v7 }
  0x3b   :  { %1705 = vmatprep.subr.bf16.mxu0 %v2499_v10 }
  0x3c   :  { %1735 = vmatpush1.bf16.msra.mxu1 %v2544_v31 }
  0x3d   :  { %1737 = vmatprep.subr.bf16.mxu1 %v2547_v32 }
  0x3e   :  { %1707 = vmatpush1.bf16.msra.mxu0 %v2532_v24 }
  0x3f   :  { %1709 = vmatprep.subr.bf16.mxu0 %v2535_v27 }
  0x40   :  { %1739 = vmatpush1.bf16.msra.mxu1 %v2566_v40 }
  0x41   :  { %1741 = vmatprep.subr.bf16.mxu1 %v2569_v41 }
  0x42   :  { %1711 = vmatpush1.bf16.msra.mxu0 %v2562_v39 }
  0x43   :  { %1745 = vmatprep.subr.bf16.mxu0 %v2304_v4 }
  0x44   :  { %1743 = vmatpush1.bf16.msra.mxu1 %v2582_v49 }
  0x45   :  { %1777 = vmatprep.subr.bf16.mxu1 %v2356_v22 }
  0xf8   :  { %v164_v53 = vpop.f32.mrb[0].mxu0 }
  0xf9   :  { %v240_v54 = vadd.f32 %v164_v53, %v94_v50  ;;  %v166_v56 = vpop.f32.mrb[1].mxu0  ;;  %v1560_v50 = vld [vmem:[%s2979_s0 + $0x20] sm:$0xff] }
  0xfa   :  { %v241_v57 = vadd.f32 %v166_v56, %v95_v51  ;;  %v235_v63 = vpop.f32.mrb[0].mxu1  ;;  %v1561_v51 = vld [vmem:[%s2979_s0 + $0x28] sm:$0xff] }
  0xfb   :  { %v1557_v59 = vmul.f32 -1.442695, %v240_v54  ;;  %v237_v1 = vpop.f32.mrb[1].mxu1  ;;  %v242_v11 = vadd.f32 %v235_v63, %v96_v5  ;;  %v1562_v5 = vld [vmem:[%s2979_s0 + $0x30] sm:$0xff] }
  0xfc   :  { %v1558_v60 = vmul.f32 -1.442695, %v241_v57  ;;  %v243_v2 = vadd.f32 %v237_v1, %v97_v61  ;;  %v1563_v1 = vld [vmem:[%s2979_s0 + $0x38] sm:$0xff] }
  0xfd   :  { %2129 = vpow2.f32 %v1557_v59 }
  0xfe   :  { %2131 = vpow2.f32 %v1558_v60  ;;  %v1559_v6 = vmul.f32 -1.442695, %v243_v2 }
 0x100   :  { %2133 = vpow2.f32 %v1559_v6 }
 0x101   :  { %2135 = vtanh.f32 %v242_v11 }
 0x107   :  { %v2130_v12 = vpop.eup %2129 }
 0x108   :  { %v2132_v13 = vpop.eup %2131  ;;  %v247_v16 = vadd.f32 1.0, %v2130_v12 }
 0x109   :  { %v253_v19 = vadd.f32 1.0, %v2132_v13 }
 0x10a   :  { %2137 = vrcp.f32 %v247_v16  ;;  %v2134_v20 = vpop.eup %2133 }
 0x10b   :  { %2139 = vrcp.f32 %v253_v19  ;;  %v2136_v21 = vpop.eup %2135  ;;  %v260_v29 = vadd.f32 1.0, %v2134_v20 }
 0x10d   :  { %2141 = vrcp.f32 %v260_v29 }
 0x114   :  { %v2138_v28 = vpop.eup %2137 }
 0x115   :  { %v2140_v34 = vpop.eup %2139  ;;  %v264_v35 = vmul.f32 %v2138_v28, %v2136_v21 }
 0x116   :  { %v263_v36 = vmul.f32 %v2140_v34, %v26_v23 }
 0x117   :  { %v2142_v43 = vpop.eup %2141 }
 0x118   :  { %v2637_v38 = vadd.f32 %v264_v35, %v263_v36 }
 0x11a   :  { %2143 = vtanh.f32 %v2637_v38 }
 0x124   :  { %v2144_v44 = vpop.eup %2143 }
 0x125   :  { %v267_v47 = vmul.f32 %v2144_v44, %v2142_v43 }
 0x127   :  { %270 = vst [vmem:[%s2981_s4] sm:$0xff] %v267_v47  ;;  %343 = vmatmul.mubr.f32.vlgmr.msra.gmra.mrb[2].mxu0 %v267_v47  ;;  %414 = vmatmul.mubr.f32.vlgmr.msra.gmra.mrb[2].mxu1 %v267_v47 }
 0x128   :  { %1747 = vmatpush1.bf16.msra.mxu0 %v2315_v8  ;;  %1779 = vmatpush1.bf16.msra.mxu1 %v2364_v25 }
 0x129   :  { %1749 = vmatprep.subr.bf16.mxu0 %v2317_v9  ;;  %1781 = vmatprep.subr.bf16.mxu1 %v2389_v33 }
 0x12a   :  { %523 = vmatprep.mubr.f32.mxu0 %v2257_v3  ;;  %594 = vmatprep.mubr.f32.mxu1 %v2257_v3 }
 0x12c   :  { %1751 = vmatpush1.bf16.msra.mxu0 %v2333_v14  ;;  %1783 = vmatpush1.bf16.msra.mxu1 %v2400_v37 }
 0x12d   :  { %1753 = vmatprep.subr.bf16.mxu0 %v2342_v17  ;;  %1785 = vmatprep.subr.bf16.mxu1 %v2424_v45 }
 0x130   :  { %1755 = vmatpush1.bf16.msra.mxu0 %v2367_v26  ;;  %1787 = vmatpush1.bf16.msra.mxu1 %v2433_v48 }
 0x131   :  { %1757 = vmatprep.subr.bf16.mxu0 %v2380_v30  ;;  %1789 = vmatprep.subr.bf16.mxu1 %v2445_v52 }
 0x134   :  { %1759 = vmatpush1.bf16.msra.mxu0 %v2416_v42  ;;  %1791 = vmatpush1.bf16.msra.mxu1 %v2475_v62 }
 0x135   :  { %1761 = vmatprep.subr.bf16.mxu0 %v2427_v46  ;;  %1793 = vmatprep.subr.bf16.mxu1 %v2481_v0 }
 0x138   :  { %1763 = vmatpush1.bf16.msra.mxu0 %v2454_v55  ;;  %1795 = vmatpush1.bf16.msra.mxu1 %v2511_v15 }
 0x139   :  { %1765 = vmatprep.subr.bf16.mxu0 %v2463_v58  ;;  %1797 = vmatprep.subr.bf16.mxu1 %v2517_v18 }
 0x13c   :  { %1767 = vmatpush1.bf16.msra.mxu0 %v2496_v7  ;;  %1799 = vmatpush1.bf16.msra.mxu1 %v2544_v31 }
 0x13d   :  { %1769 = vmatprep.subr.bf16.mxu0 %v2499_v10  ;;  %1801 = vmatprep.subr.bf16.mxu1 %v2547_v32 }
 0x140   :  { %1771 = vmatpush1.bf16.msra.mxu0 %v2532_v24  ;;  %1803 = vmatpush1.bf16.msra.mxu1 %v2566_v40 }
 0x141   :  { %1773 = vmatprep.subr.bf16.mxu0 %v2535_v27  ;;  %1805 = vmatprep.subr.bf16.mxu1 %v2569_v41 }
 0x144   :  { %1775 = vmatpush1.bf16.msra.mxu0 %v2562_v39  ;;  %1807 = vmatpush1.bf16.msra.mxu1 %v2582_v49 }
 0x145   :  { %1809 = vmatprep.subr.bf16.mxu0 %v2304_v4  ;;  %1841 = vmatprep.subr.bf16.mxu1 %v2356_v22 }
 0x1fa   :  { %v344_v53 = vpop.f32.mrb[2].mxu0  ;;  %v415_v54 = vpop.f32.mrb[2].mxu1 }
 0x1fb   :  { %v420_v56 = vadd.f32 %v1560_v50, %v344_v53  ;;  %v346_v57 = vpop.f32.mrb[3].mxu0  ;;  %v417_v59 = vpop.f32.mrb[3].mxu1  ;;  %v422_v11 = vadd.f32 %v1562_v5, %v415_v54  ;;  %v1569_v50 = vld [vmem:[%s2979_s0 + $0x48] sm:$0xff] }
 0x1fc   :  { %v421_v60 = vadd.f32 %v1561_v51, %v346_v57  ;;  %v423_v2 = vadd.f32 %v1563_v1, %v417_v59 }
 0x1fd   :  { %v1564_v61 = vmul.f32 -1.442695, %v420_v56 }
 0x1fe   :  { %v1565_v63 = vmul.f32 -1.442695, %v421_v60  ;;  %v1566_v6 = vmul.f32 -1.442695, %v423_v2  ;;  %v1570_v2 = vld [vmem:[%s2979_s0 + $0x50] sm:$0xff] }
 0x1ff   :  { %2145 = vpow2.f32 %v1564_v61 }
 0x200   :  { %2147 = vpow2.f32 %v1565_v63  ;;  %v1571_v63 = vld [vmem:[%s2979_s0 + $0x58] sm:$0xff] }
 0x201   :  { %2149 = vpow2.f32 %v1566_v6 }
 0x202   :  { %2151 = vtanh.f32 %v422_v11 }
 0x209   :  { %v2146_v12 = vpop.eup %2145 }
 0x20a   :  { %v2148_v13 = vpop.eup %2147  ;;  %v427_v16 = vadd.f32 1.0, %v2146_v12 }
 0x20b   :  { %v433_v19 = vadd.f32 1.0, %v2148_v13  ;;  %v2150_v20 = vpop.eup %2149 }
 0x20c   :  { %2153 = vrcp.f32 %v427_v16  ;;  %v2152_v21 = vpop.eup %2151  ;;  %v440_v34 = vadd.f32 1.0, %v2150_v20 }
 0x20d   :  { %2155 = vrcp.f32 %v433_v19 }
 0x20e   :  { %2157 = vrcp.f32 %v440_v34 }
 0x216   :  { %v2154_v23 = vpop.eup %2153 }
 0x217   :  { %v2156_v28 = vpop.eup %2155  ;;  %v444_v29 = vmul.f32 %v2154_v23, %v2152_v21 }
 0x218   :  { %v443_v35 = vmul.f32 %v2156_v28, %v2637_v38  ;;  %v2158_v43 = vpop.eup %2157  ;;  %v1568_v38 = vld [vmem:[%s2979_s0 + $0x40] sm:$0xff] }
 0x21a   :  { %v2690_v36 = vadd.f32 %v444_v29, %v443_v35 }
 0x21c   :  { %2159 = vtanh.f32 %v2690_v36 }
 0x226   :  { %v2160_v44 = vpop.eup %2159 }
 0x227   :  { %v447_v47 = vmul.f32 %v2160_v44, %v2158_v43 }
 0x229   :  { %1567 = vst [vmem:[%s2981_s4 + $0x8] sm:$0xff] %v447_v47  ;;  %524 = vmatmul.mubr.f32.vlgmr.msra.gmra.mrb[4].mxu0 %v447_v47  ;;  %595 = vmatmul.mubr.f32.vlgmr.msra.gmra.mrb[4].mxu1 %v447_v47 }
 0x22a   :  { %1811 = vmatpush1.bf16.msra.mxu0 %v2315_v8  ;;  %1843 = vmatpush1.bf16.msra.mxu1 %v2364_v25 }
 0x22b   :  { %1813 = vmatprep.subr.bf16.mxu0 %v2317_v9  ;;  %1845 = vmatprep.subr.bf16.mxu1 %v2389_v33 }
 0x22c   :  { %704 = vmatprep.mubr.f32.mxu0 %v2257_v3  ;;  %775 = vmatprep.mubr.f32.mxu1 %v2257_v3 }
 0x22e   :  { %1815 = vmatpush1.bf16.msra.mxu0 %v2333_v14  ;;  %1847 = vmatpush1.bf16.msra.mxu1 %v2400_v37 }
 0x22f   :  { %1817 = vmatprep.subr.bf16.mxu0 %v2342_v17  ;;  %1849 = vmatprep.subr.bf16.mxu1 %v2424_v45 }
 0x232   :  { %1819 = vmatpush1.bf16.msra.mxu0 %v2367_v26  ;;  %1851 = vmatpush1.bf16.msra.mxu1 %v2433_v48 }
 0x233   :  { %1821 = vmatprep.subr.bf16.mxu0 %v2380_v30  ;;  %1853 = vmatprep.subr.bf16.mxu1 %v2445_v52 }
 0x236   :  { %1823 = vmatpush1.bf16.msra.mxu0 %v2416_v42  ;;  %1855 = vmatpush1.bf16.msra.mxu1 %v2475_v62 }
 0x237   :  { %1825 = vmatprep.subr.bf16.mxu0 %v2427_v46  ;;  %1857 = vmatprep.subr.bf16.mxu1 %v2481_v0 }
 0x23a   :  { %1827 = vmatpush1.bf16.msra.mxu0 %v2454_v55  ;;  %1859 = vmatpush1.bf16.msra.mxu1 %v2511_v15 }
 0x23b   :  { %1829 = vmatprep.subr.bf16.mxu0 %v2463_v58  ;;  %1861 = vmatprep.subr.bf16.mxu1 %v2517_v18 }
 0x23e   :  { %1831 = vmatpush1.bf16.msra.mxu0 %v2496_v7  ;;  %1863 = vmatpush1.bf16.msra.mxu1 %v2544_v31 }
 0x23f   :  { %1833 = vmatprep.subr.bf16.mxu0 %v2499_v10  ;;  %1865 = vmatprep.subr.bf16.mxu1 %v2547_v32 }
 0x242   :  { %1835 = vmatpush1.bf16.msra.mxu0 %v2532_v24  ;;  %1867 = vmatpush1.bf16.msra.mxu1 %v2566_v40 }
 0x243   :  { %1837 = vmatprep.subr.bf16.mxu0 %v2535_v27  ;;  %1869 = vmatprep.subr.bf16.mxu1 %v2569_v41 }
 0x246   :  { %1839 = vmatpush1.bf16.msra.mxu0 %v2562_v39  ;;  %1871 = vmatpush1.bf16.msra.mxu1 %v2582_v49 }
 0x247   :  { %1873 = vmatprep.subr.bf16.mxu0 %v2304_v4  ;;  %1905 = vmatprep.subr.bf16.mxu1 %v2356_v22 }
 0x2fc   :  { %v525_v51 = vpop.f32.mrb[4].mxu0  ;;  %v596_v53 = vpop.f32.mrb[4].mxu1 }
 0x2fd   :  { %v601_v54 = vadd.f32 %v1568_v38, %v525_v51  ;;  %v527_v56 = vpop.f32.mrb[5].mxu0  ;;  %v598_v57 = vpop.f32.mrb[5].mxu1  ;;  %v603_v6 = vadd.f32 %v1570_v2, %v596_v53  ;;  %v1577_v38 = vld [vmem:[%s2979_s0 + $0x68] sm:$0xff] }
 0x2fe   :  { %v602_v59 = vadd.f32 %v1569_v50, %v527_v56  ;;  %v604_v1 = vadd.f32 %v1571_v63, %v598_v57 }
 0x2ff   :  { %v1572_v60 = vmul.f32 -1.442695, %v601_v54 }
 0x300   :  { %v1573_v61 = vmul.f32 -1.442695, %v602_v59  ;;  %v1574_v5 = vmul.f32 -1.442695, %v604_v1  ;;  %v1578_v1 = vld [vmem:[%s2979_s0 + $0x70] sm:$0xff] }
 0x301   :  { %2161 = vpow2.f32 %v1572_v60 }
 0x302   :  { %2163 = vpow2.f32 %v1573_v61  ;;  %v1579_v61 = vld [vmem:[%s2979_s0 + $0x78] sm:$0xff] }
 0x303   :  { %2165 = vpow2.f32 %v1574_v5 }
 0x304   :  { %2167 = vtanh.f32 %v603_v6 }
 0x30b   :  { %v2162_v11 = vpop.eup %2161 }
 0x30c   :  { %v2164_v12 = vpop.eup %2163  ;;  %v608_v13 = vadd.f32 1.0, %v2162_v11 }
 0x30d   :  { %v614_v16 = vadd.f32 1.0, %v2164_v12  ;;  %v2166_v19 = vpop.eup %2165 }
 0x30e   :  { %2169 = vrcp.f32 %v608_v13  ;;  %v2168_v20 = vpop.eup %2167  ;;  %v621_v29 = vadd.f32 1.0, %v2166_v19 }
 0x30f   :  { %2171 = vrcp.f32 %v614_v16 }
 0x310   :  { %2173 = vrcp.f32 %v621_v29 }
 0x318   :  { %v2170_v21 = vpop.eup %2169 }
 0x319   :  { %v2172_v23 = vpop.eup %2171  ;;  %v625_v28 = vmul.f32 %v2170_v21, %v2168_v20 }
 0x31a   :  { %v624_v34 = vmul.f32 %v2172_v23, %v2690_v36  ;;  %v2174_v43 = vpop.eup %2173  ;;  %v1576_v36 = vld [vmem:[%s2979_s0 + $0x60] sm:$0xff] }
 0x31c   :  { %v2743_v35 = vadd.f32 %v625_v28, %v624_v34 }
 0x31e   :  { %2175 = vtanh.f32 %v2743_v35 }
 0x328   :  { %v2176_v44 = vpop.eup %2175 }
 0x329   :  { %v628_v47 = vmul.f32 %v2176_v44, %v2174_v43 }
 0x32b   :  { %1575 = vst [vmem:[%s2981_s4 + $0x10] sm:$0xff] %v628_v47  ;;  %705 = vmatmul.mubr.f32.vlgmr.msra.gmra.mrb[6].mxu0 %v628_v47  ;;  %776 = vmatmul.mubr.f32.vlgmr.msra.gmra.mrb[6].mxu1 %v628_v47 }
 0x32c   :  { %1875 = vmatpush1.bf16.msra.mxu0 %v2315_v8  ;;  %1907 = vmatpush1.bf16.msra.mxu1 %v2364_v25 }
 0x32d   :  { %1877 = vmatprep.subr.bf16.mxu0 %v2317_v9  ;;  %1909 = vmatprep.subr.bf16.mxu1 %v2389_v33 }
 0x32e   :  { %885 = vmatprep.mubr.f32.mxu0 %v2257_v3  ;;  %956 = vmatprep.mubr.f32.mxu1 %v2257_v3 }
 0x330   :  { %1879 = vmatpush1.bf16.msra.mxu0 %v2333_v14  ;;  %1911 = vmatpush1.bf16.msra.mxu1 %v2400_v37 }
 0x331   :  { %1881 = vmatprep.subr.bf16.mxu0 %v2342_v17  ;;  %1913 = vmatprep.subr.bf16.mxu1 %v2424_v45 }
 0x334   :  { %1883 = vmatpush1.bf16.msra.mxu0 %v2367_v26  ;;  %1915 = vmatpush1.bf16.msra.mxu1 %v2433_v48 }
 0x335   :  { %1885 = vmatprep.subr.bf16.mxu0 %v2380_v30  ;;  %1917 = vmatprep.subr.bf16.mxu1 %v2445_v52 }
 0x338   :  { %1887 = vmatpush1.bf16.msra.mxu0 %v2416_v42  ;;  %1919 = vmatpush1.bf16.msra.mxu1 %v2475_v62 }
 0x339   :  { %1889 = vmatprep.subr.bf16.mxu0 %v2427_v46  ;;  %1921 = vmatprep.subr.bf16.mxu1 %v2481_v0 }
 0x33c   :  { %1891 = vmatpush1.bf16.msra.mxu0 %v2454_v55  ;;  %1923 = vmatpush1.bf16.msra.mxu1 %v2511_v15 }
 0x33d   :  { %1893 = vmatprep.subr.bf16.mxu0 %v2463_v58  ;;  %1925 = vmatprep.subr.bf16.mxu1 %v2517_v18 }
 0x340   :  { %1895 = vmatpush1.bf16.msra.mxu0 %v2496_v7  ;;  %1927 = vmatpush1.bf16.msra.mxu1 %v2544_v31 }
 0x341   :  { %1897 = vmatprep.subr.bf16.mxu0 %v2499_v10  ;;  %1929 = vmatprep.subr.bf16.mxu1 %v2547_v32 }
 0x344   :  { %1899 = vmatpush1.bf16.msra.mxu0 %v2532_v24  ;;  %1931 = vmatpush1.bf16.msra.mxu1 %v2566_v40 }
 0x345   :  { %1901 = vmatprep.subr.bf16.mxu0 %v2535_v27  ;;  %1933 = vmatprep.subr.bf16.mxu1 %v2569_v41 }
 0x348   :  { %1903 = vmatpush1.bf16.msra.mxu0 %v2562_v39  ;;  %1935 = vmatpush1.bf16.msra.mxu1 %v2582_v49 }
 0x349   :  { %1937 = vmatprep.subr.bf16.mxu0 %v2304_v4  ;;  %1969 = vmatprep.subr.bf16.mxu1 %v2356_v22 }
 0x3fe   :  { %v706_v50 = vpop.f32.mrb[6].mxu0  ;;  %v777_v51 = vpop.f32.mrb[6].mxu1 }
 0x3ff   :  { %v782_v53 = vadd.f32 %v1576_v36, %v706_v50  ;;  %v708_v54 = vpop.f32.mrb[7].mxu0  ;;  %v779_v56 = vpop.f32.mrb[7].mxu1  ;;  %v784_v5 = vadd.f32 %v1578_v1, %v777_v51  ;;  %v1585_v36 = vld [vmem:[%s2979_s0 + $0x88] sm:$0xff] }
 0x400   :  { %v783_v57 = vadd.f32 %v1577_v38, %v708_v54  ;;  %v785_v63 = vadd.f32 %v1579_v61, %v779_v56 }
 0x401   :  { %v1580_v59 = vmul.f32 -1.442695, %v782_v53 }
 0x402   :  { %v1581_v60 = vmul.f32 -1.442695, %v783_v57  ;;  %v1582_v2 = vmul.f32 -1.442695, %v785_v63  ;;  %v1586_v63 = vld [vmem:[%s2979_s0 + $0x90] sm:$0xff] }
 0x403   :  { %2177 = vpow2.f32 %v1580_v59 }
 0x404   :  { %2179 = vpow2.f32 %v1581_v60  ;;  %v1587_v60 = vld [vmem:[%s2979_s0 + $0x98] sm:$0xff] }
 0x405   :  { %2181 = vpow2.f32 %v1582_v2 }
 0x406   :  { %2183 = vtanh.f32 %v784_v5 }
 0x40d   :  { %v2178_v6 = vpop.eup %2177 }
 0x40e   :  { %v2180_v11 = vpop.eup %2179  ;;  %v789_v12 = vadd.f32 1.0, %v2178_v6 }
 0x40f   :  { %v795_v13 = vadd.f32 1.0, %v2180_v11  ;;  %v2182_v16 = vpop.eup %2181 }
 0x410   :  { %2185 = vrcp.f32 %v789_v12  ;;  %v2184_v19 = vpop.eup %2183  ;;  %v802_v28 = vadd.f32 1.0, %v2182_v16 }
 0x411   :  { %2187 = vrcp.f32 %v795_v13 }
 0x412   :  { %2189 = vrcp.f32 %v802_v28 }
 0x41a   :  { %v2186_v20 = vpop.eup %2185 }
 0x41b   :  { %v2188_v21 = vpop.eup %2187  ;;  %v806_v23 = vmul.f32 %v2186_v20, %v2184_v19 }
 0x41c   :  { %v805_v29 = vmul.f32 %v2188_v21, %v2743_v35  ;;  %v2190_v43 = vpop.eup %2189  ;;  %v1584_v35 = vld [vmem:[%s2979_s0 + $0x80] sm:$0xff] }
 0x41e   :  { %v2796_v34 = vadd.f32 %v806_v23, %v805_v29 }
 0x420   :  { %2191 = vtanh.f32 %v2796_v34 }
 0x42a   :  { %v2192_v44 = vpop.eup %2191 }
 0x42b   :  { %v809_v47 = vmul.f32 %v2192_v44, %v2190_v43 }
 0x42d   :  { %1583 = vst [vmem:[%s2981_s4 + $0x18] sm:$0xff] %v809_v47  ;;  %886 = vmatmul.mubr.f32.vlgmr.msra.gmra.mrb[8].mxu0 %v809_v47  ;;  %957 = vmatmul.mubr.f32.vlgmr.msra.gmra.mrb[8].mxu1 %v809_v47 }
 0x42e   :  { %1939 = vmatpush1.bf16.msra.mxu0 %v2315_v8  ;;  %1971 = vmatpush1.bf16.msra.mxu1 %v2364_v25 }
 0x42f   :  { %1941 = vmatprep.subr.bf16.mxu0 %v2317_v9  ;;  %1973 = vmatprep.subr.bf16.mxu1 %v2389_v33 }
 0x430   :  { %1066 = vmatprep.mubr.f32.mxu0 %v2257_v3  ;;  %1137 = vmatprep.mubr.f32.mxu1 %v2257_v3 }
 0x432   :  { %1943 = vmatpush1.bf16.msra.mxu0 %v2333_v14  ;;  %1975 = vmatpush1.bf16.msra.mxu1 %v2400_v37 }
 0x433   :  { %1945 = vmatprep.subr.bf16.mxu0 %v2342_v17  ;;  %1977 = vmatprep.subr.bf16.mxu1 %v2424_v45 }
 0x436   :  { %1947 = vmatpush1.bf16.msra.mxu0 %v2367_v26  ;;  %1979 = vmatpush1.bf16.msra.mxu1 %v2433_v48 }
 0x437   :  { %1949 = vmatprep.subr.bf16.mxu0 %v2380_v30  ;;  %1981 = vmatprep.subr.bf16.mxu1 %v2445_v52 }
 0x43a   :  { %1951 = vmatpush1.bf16.msra.mxu0 %v2416_v42  ;;  %1983 = vmatpush1.bf16.msra.mxu1 %v2475_v62 }
 0x43b   :  { %1953 = vmatprep.subr.bf16.mxu0 %v2427_v46  ;;  %1985 = vmatprep.subr.bf16.mxu1 %v2481_v0 }
 0x43e   :  { %1955 = vmatpush1.bf16.msra.mxu0 %v2454_v55  ;;  %1987 = vmatpush1.bf16.msra.mxu1 %v2511_v15 }
 0x43f   :  { %1957 = vmatprep.subr.bf16.mxu0 %v2463_v58  ;;  %1989 = vmatprep.subr.bf16.mxu1 %v2517_v18 }
 0x442   :  { %1959 = vmatpush1.bf16.msra.mxu0 %v2496_v7  ;;  %1991 = vmatpush1.bf16.msra.mxu1 %v2544_v31 }
 0x443   :  { %1961 = vmatprep.subr.bf16.mxu0 %v2499_v10  ;;  %1993 = vmatprep.subr.bf16.mxu1 %v2547_v32 }
 0x446   :  { %1963 = vmatpush1.bf16.msra.mxu0 %v2532_v24  ;;  %1995 = vmatpush1.bf16.msra.mxu1 %v2566_v40 }
 0x447   :  { %1965 = vmatprep.subr.bf16.mxu0 %v2535_v27  ;;  %1997 = vmatprep.subr.bf16.mxu1 %v2569_v41 }
 0x44a   :  { %1967 = vmatpush1.bf16.msra.mxu0 %v2562_v39  ;;  %1999 = vmatpush1.bf16.msra.mxu1 %v2582_v49 }
 0x44b   :  { %2001 = vmatprep.subr.bf16.mxu0 %v2304_v4  ;;  %2033 = vmatprep.subr.bf16.mxu1 %v2356_v22 }
 0x500   :  { %v887_v38 = vpop.f32.mrb[8].mxu0  ;;  %v958_v50 = vpop.f32.mrb[8].mxu1 }
 0x501   :  { %v963_v51 = vadd.f32 %v1584_v35, %v887_v38  ;;  %v889_v53 = vpop.f32.mrb[9].mxu0  ;;  %v960_v54 = vpop.f32.mrb[9].mxu1  ;;  %v965_v2 = vadd.f32 %v1586_v63, %v958_v50  ;;  %v1593_v35 = vld [vmem:[%s2979_s0 + $0xa8] sm:$0xff] }
 0x502   :  { %v964_v56 = vadd.f32 %v1585_v36, %v889_v53  ;;  %v966_v61 = vadd.f32 %v1587_v60, %v960_v54 }
 0x503   :  { %v1588_v57 = vmul.f32 -1.442695, %v963_v51 }
 0x504   :  { %v1589_v59 = vmul.f32 -1.442695, %v964_v56  ;;  %v1590_v1 = vmul.f32 -1.442695, %v966_v61 }
 0x505   :  { %2193 = vpow2.f32 %v1588_v57 }
 0x506   :  { %2195 = vpow2.f32 %v1589_v59  ;;  %v1594_v59 = vld [vmem:[%s2979_s0 + $0xb0] sm:$0xff] }
 0x507   :  { %2197 = vpow2.f32 %v1590_v1 }
 0x508   :  { %2199 = vtanh.f32 %v965_v2 }
 0x50f   :  { %v2194_v5 = vpop.eup %2193 }
 0x510   :  { %v2196_v6 = vpop.eup %2195  ;;  %v970_v11 = vadd.f32 1.0, %v2194_v5 }
 0x511   :  { %v976_v12 = vadd.f32 1.0, %v2196_v6  ;;  %v2198_v13 = vpop.eup %2197 }
 0x512   :  { %2201 = vrcp.f32 %v970_v11  ;;  %v2200_v16 = vpop.eup %2199  ;;  %v983_v23 = vadd.f32 1.0, %v2198_v13 }
 0x513   :  { %2203 = vrcp.f32 %v976_v12 }
 0x514   :  { %2205 = vrcp.f32 %v983_v23 }
 0x51c   :  { %v2202_v19 = vpop.eup %2201 }
 0x51d   :  { %v2204_v20 = vpop.eup %2203  ;;  %v987_v21 = vmul.f32 %v2202_v19, %v2200_v16 }
 0x51e   :  { %v986_v28 = vmul.f32 %v2204_v20, %v2796_v34  ;;  %v2206_v43 = vpop.eup %2205  ;;  %v1592_v34 = vld [vmem:[%s2979_s0 + $0xa0] sm:$0xff] }
 0x520   :  { %v2849_v29 = vadd.f32 %v987_v21, %v986_v28 }
 0x522   :  { %2207 = vtanh.f32 %v2849_v29 }
 0x52c   :  { %v2208_v44 = vpop.eup %2207 }
 0x52d   :  { %v990_v47 = vmul.f32 %v2208_v44, %v2206_v43 }
 0x52f   :  { %1591 = vst [vmem:[%s2981_s4 + $0x20] sm:$0xff] %v990_v47  ;;  %1067 = vmatmul.mubr.f32.vlgmr.msra.gmra.mrb[10].mxu0 %v990_v47  ;;  %1138 = vmatmul.mubr.f32.vlgmr.msra.gmra.mrb[10].mxu1 %v990_v47 }
 0x530   :  { %2003 = vmatpush1.bf16.msra.mxu0 %v2315_v8  ;;  %2035 = vmatpush1.bf16.msra.mxu1 %v2364_v25 }
 0x531   :  { %2005 = vmatprep.subr.bf16.mxu0 %v2317_v9  ;;  %2037 = vmatprep.subr.bf16.mxu1 %v2389_v33 }
 0x532   :  { %1247 = vmatprep.mubr.f32.mxu0 %v2257_v3  ;;  %1318 = vmatprep.mubr.f32.mxu1 %v2257_v3 }
 0x534   :  { %2007 = vmatpush1.bf16.msra.mxu0 %v2333_v14  ;;  %2039 = vmatpush1.bf16.msra.mxu1 %v2400_v37 }
 0x535   :  { %2009 = vmatprep.subr.bf16.mxu0 %v2342_v17  ;;  %2041 = vmatprep.subr.bf16.mxu1 %v2424_v45 }
 0x538   :  { %2011 = vmatpush1.bf16.msra.mxu0 %v2367_v26  ;;  %2043 = vmatpush1.bf16.msra.mxu1 %v2433_v48 }
 0x539   :  { %2013 = vmatprep.subr.bf16.mxu0 %v2380_v30  ;;  %2045 = vmatprep.subr.bf16.mxu1 %v2445_v52 }
 0x53c   :  { %2015 = vmatpush1.bf16.msra.mxu0 %v2416_v42  ;;  %2047 = vmatpush1.bf16.msra.mxu1 %v2475_v62 }
 0x53d   :  { %2017 = vmatprep.subr.bf16.mxu0 %v2427_v46  ;;  %2049 = vmatprep.subr.bf16.mxu1 %v2481_v0 }
 0x540   :  { %2019 = vmatpush1.bf16.msra.mxu0 %v2454_v55  ;;  %2051 = vmatpush1.bf16.msra.mxu1 %v2511_v15 }
 0x541   :  { %2021 = vmatprep.subr.bf16.mxu0 %v2463_v58  ;;  %2053 = vmatprep.subr.bf16.mxu1 %v2517_v18 }
 0x544   :  { %2023 = vmatpush1.bf16.msra.mxu0 %v2496_v7  ;;  %2055 = vmatpush1.bf16.msra.mxu1 %v2544_v31 }
 0x545   :  { %2025 = vmatprep.subr.bf16.mxu0 %v2499_v10  ;;  %2057 = vmatprep.subr.bf16.mxu1 %v2547_v32 }
 0x548   :  { %2027 = vmatpush1.bf16.msra.mxu0 %v2532_v24  ;;  %2059 = vmatpush1.bf16.msra.mxu1 %v2566_v40 }
 0x549   :  { %2029 = vmatprep.subr.bf16.mxu0 %v2535_v27  ;;  %2061 = vmatprep.subr.bf16.mxu1 %v2569_v41 }
 0x54c   :  { %2031 = vmatpush1.bf16.msra.mxu0 %v2562_v39  ;;  %2063 = vmatpush1.bf16.msra.mxu1 %v2582_v49 }
 0x54d   :  { %2065 = vmatprep.subr.bf16.mxu0 %v2304_v4  ;;  %2097 = vmatprep.subr.bf16.mxu1 %v2356_v22  ;;  %v1595_v4 = vld [vmem:[%s2979_s0 + $0xb8] sm:$0xff] }
 0x602   :  { %v1068_v36 = vpop.f32.mrb[10].mxu0  ;;  %v1139_v38 = vpop.f32.mrb[10].mxu1 }
 0x603   :  { %v1144_v50 = vadd.f32 %v1592_v34, %v1068_v36  ;;  %v1070_v51 = vpop.f32.mrb[11].mxu0  ;;  %v1141_v53 = vpop.f32.mrb[11].mxu1  ;;  %v1146_v61 = vadd.f32 %v1594_v59, %v1139_v38 }
 0x604   :  { %v1145_v54 = vadd.f32 %v1593_v35, %v1070_v51  ;;  %v1147_v22 = vadd.f32 %v1595_v4, %v1141_v53  ;;  %v1611_v53 = vld [vmem:[%s2979_s0 + $0xf8] sm:$0xff] }
 0x605   :  { %v1596_v56 = vmul.f32 -1.442695, %v1144_v50 }
 0x606   :  { %v1597_v57 = vmul.f32 -1.442695, %v1145_v54  ;;  %v1598_v60 = vmul.f32 -1.442695, %v1147_v22 }
 0x607   :  { %2209 = vpow2.f32 %v1596_v56  ;;  %v1610_v56 = vld [vmem:[%s2979_s0 + $0xf0] sm:$0xff] }
 0x608   :  { %2211 = vpow2.f32 %v1597_v57 }
 0x609   :  { %2213 = vpow2.f32 %v1598_v60 }
 0x60a   :  { %2215 = vtanh.f32 %v1146_v61 }
 0x611   :  { %v2210_v63 = vpop.eup %2209 }
 0x612   :  { %v2212_v1 = vpop.eup %2211  ;;  %v1151_v2 = vadd.f32 1.0, %v2210_v63 }
 0x613   :  { %v1157_v5 = vadd.f32 1.0, %v2212_v1  ;;  %v2214_v6 = vpop.eup %2213 }
 0x614   :  { %2217 = vrcp.f32 %v1151_v2  ;;  %v2216_v11 = vpop.eup %2215  ;;  %v1164_v19 = vadd.f32 1.0, %v2214_v6 }
 0x615   :  { %2219 = vrcp.f32 %v1157_v5 }
 0x616   :  { %2221 = vrcp.f32 %v1164_v19 }
 0x61e   :  { %v2218_v12 = vpop.eup %2217 }
 0x61f   :  { %v2220_v13 = vpop.eup %2219  ;;  %v1168_v16 = vmul.f32 %v2218_v12, %v2216_v11 }
 0x620   :  { %v1167_v20 = vmul.f32 %v2220_v13, %v2849_v29  ;;  %v2222_v23 = vpop.eup %2221  ;;  %v1609_v29 = vld [vmem:[%s2979_s0 + $0xe8] sm:$0xff] }
 0x622   :  { %v2902_v21 = vadd.f32 %v1168_v16, %v1167_v20 }
 0x624   :  { %2223 = vtanh.f32 %v2902_v21 }
 0x62e   :  { %v2224_v28 = vpop.eup %2223 }
 0x62f   :  { %v1171_v43 = vmul.f32 %v2224_v28, %v2222_v23 }
 0x631   :  { %1599 = vst [vmem:[%s2981_s4 + $0x28] sm:$0xff] %v1171_v43  ;;  %1248 = vmatmul.mubr.f32.vlgmr.msra.gmra.mrb[12].mxu0 %v1171_v43  ;;  %1319 = vmatmul.mubr.f32.vlgmr.msra.gmra.mrb[12].mxu1 %v1171_v43 }
 0x632   :  { %2067 = vmatpush1.bf16.msra.mxu0 %v2315_v8  ;;  %2099 = vmatpush1.bf16.msra.mxu1 %v2364_v25  ;;  %v1601_v8 = vld [vmem:[%s2979_s0 + $0xc8] sm:$0xff] }
 0x633   :  { %2069 = vmatprep.subr.bf16.mxu0 %v2317_v9  ;;  %2101 = vmatprep.subr.bf16.mxu1 %v2389_v33 }
 0x634   :  { %1428 = vmatprep.mubr.f32.mxu0 %v2257_v3  ;;  %1499 = vmatprep.mubr.f32.mxu1 %v2257_v3  ;;  %v1600_v3 = vld [vmem:[%s2979_s0 + $0xc0] sm:$0xff] }
 0x636   :  { %2071 = vmatpush1.bf16.msra.mxu0 %v2333_v14  ;;  %2103 = vmatpush1.bf16.msra.mxu1 %v2400_v37 }
 0x637   :  { %2073 = vmatprep.subr.bf16.mxu0 %v2342_v17  ;;  %2105 = vmatprep.subr.bf16.mxu1 %v2424_v45 }
 0x63a   :  { %2075 = vmatpush1.bf16.msra.mxu0 %v2367_v26  ;;  %2107 = vmatpush1.bf16.msra.mxu1 %v2433_v48 }
 0x63b   :  { %2077 = vmatprep.subr.bf16.mxu0 %v2380_v30  ;;  %2109 = vmatprep.subr.bf16.mxu1 %v2445_v52 }
 0x63e   :  { %2079 = vmatpush1.bf16.msra.mxu0 %v2416_v42  ;;  %2111 = vmatpush1.bf16.msra.mxu1 %v2475_v62  ;;  %v1603_v42 = vld [vmem:[%s2979_s0 + $0xd8] sm:$0xff] }
 0x63f   :  { %2081 = vmatprep.subr.bf16.mxu0 %v2427_v46  ;;  %2113 = vmatprep.subr.bf16.mxu1 %v2481_v0  ;;  %v1602_v46 = vld [vmem:[%s2979_s0 + $0xd0] sm:$0xff] }
 0x642   :  { %2083 = vmatpush1.bf16.msra.mxu0 %v2454_v55  ;;  %2115 = vmatpush1.bf16.msra.mxu1 %v2511_v15 }
 0x643   :  { %2085 = vmatprep.subr.bf16.mxu0 %v2463_v58  ;;  %2117 = vmatprep.subr.bf16.mxu1 %v2517_v18 }
 0x646   :  { %2087 = vmatpush1.bf16.msra.mxu0 %v2496_v7  ;;  %2119 = vmatpush1.bf16.msra.mxu1 %v2544_v31 }
 0x647   :  { %2089 = vmatprep.subr.bf16.mxu0 %v2499_v10  ;;  %2121 = vmatprep.subr.bf16.mxu1 %v2547_v32 }
 0x64a   :  { %2091 = vmatpush1.bf16.msra.mxu0 %v2532_v24  ;;  %2123 = vmatpush1.bf16.msra.mxu1 %v2566_v40 }
 0x64b   :  { %2093 = vmatprep.subr.bf16.mxu0 %v2535_v27  ;;  %2125 = vmatprep.subr.bf16.mxu1 %v2569_v41 }
 0x64e   :  { %2095 = vmatpush1.bf16.msra.mxu0 %v2562_v39  ;;  %2127 = vmatpush1.bf16.msra.mxu1 %v2582_v49  ;;  %v1608_v49 = vld [vmem:[%s2979_s0 + $0xe0] sm:$0xff] }
 0x704   :  { %v1249_v9 = vpop.f32.mrb[12].mxu0  ;;  %v1320_v14 = vpop.f32.mrb[12].mxu1 }
 0x705   :  { %v1325_v17 = vadd.f32 %v1600_v3, %v1249_v9  ;;  %v1251_v25 = vpop.f32.mrb[13].mxu0  ;;  %v1322_v26 = vpop.f32.mrb[13].mxu1  ;;  %v1327_v52 = vadd.f32 %v1602_v46, %v1320_v14 }
 0x706   :  { %v1326_v30 = vadd.f32 %v1601_v8, %v1251_v25  ;;  %v1328_v45 = vadd.f32 %v1603_v42, %v1322_v26 }
 0x707   :  { %v1604_v33 = vmul.f32 -1.442695, %v1325_v17 }
 0x708   :  { %v1605_v37 = vmul.f32 -1.442695, %v1326_v30  ;;  %v1606_v48 = vmul.f32 -1.442695, %v1328_v45 }
 0x709   :  { %2225 = vpow2.f32 %v1604_v33 }
 0x70a   :  { %2227 = vpow2.f32 %v1605_v37 }
 0x70b   :  { %2229 = vpow2.f32 %v1606_v48 }
 0x70c   :  { %2231 = vtanh.f32 %v1327_v52 }
 0x713   :  { %v2226_v55 = vpop.eup %2225 }
 0x714   :  { %v2228_v58 = vpop.eup %2227  ;;  %v1332_v62 = vadd.f32 1.0, %v2226_v55 }
 0x715   :  { %v1338_v0 = vadd.f32 1.0, %v2228_v58  ;;  %v2230_v7 = vpop.eup %2229 }
 0x716   :  { %2233 = vrcp.f32 %v1332_v62  ;;  %v2232_v10 = vpop.eup %2231  ;;  %v1345_v27 = vadd.f32 1.0, %v2230_v7 }
 0x717   :  { %2235 = vrcp.f32 %v1338_v0 }
 0x718   :  { %2237 = vrcp.f32 %v1345_v27 }
 0x720   :  { %v2234_v15 = vpop.eup %2233 }
 0x721   :  { %v2236_v18 = vpop.eup %2235  ;;  %v1349_v24 = vmul.f32 %v2234_v15, %v2232_v10 }
 0x722   :  { %v1348_v31 = vmul.f32 %v2236_v18, %v2902_v21  ;;  %v2238_v39 = vpop.eup %2237 }
 0x724   :  { %v1350_v32 = vadd.f32 %v1349_v24, %v1348_v31 }
 0x726   :  { %2239 = vtanh.f32 %v1350_v32 }
 0x730   :  { %v2240_v40 = vpop.eup %2239 }
 0x731   :  { %v1352_v41 = vmul.f32 %v2240_v40, %v2238_v39 }
 0x733   :  { %1607 = vst [vmem:[%s2981_s4 + $0x30] sm:$0xff] %v1352_v41  ;;  %1429 = vmatmul.mubr.f32.vlgmr.msra.gmra.mrb[14].mxu0 %v1352_v41  ;;  %1500 = vmatmul.mubr.f32.vlgmr.msra.gmra.mrb[14].mxu1 %v1352_v41 }
 0x806   :  { %v1430_v44 = vpop.f32.mrb[14].mxu0  ;;  %v1501_v47 = vpop.f32.mrb[14].mxu1 }
 0x807   :  { %v1506_v34 = vadd.f32 %v1608_v49, %v1430_v44  ;;  %v1432_v35 = vpop.f32.mrb[15].mxu0  ;;  %v1503_v36 = vpop.f32.mrb[15].mxu1  ;;  %v1508_v4 = vadd.f32 %v1610_v56, %v1501_v47 }
 0x808   :  { %v1507_v38 = vadd.f32 %v1609_v29, %v1432_v35  ;;  %v1509_v54 = vadd.f32 %v1611_v53, %v1503_v36 }
 0x809   :  { %v1612_v50 = vmul.f32 -1.442695, %v1506_v34 }
 0x80a   :  { %v1613_v51 = vmul.f32 -1.442695, %v1507_v38  ;;  %v1614_v57 = vmul.f32 -1.442695, %v1509_v54 }
 0x80b   :  { %2241 = vpow2.f32 %v1612_v50 }
 0x80c   :  { %2243 = vpow2.f32 %v1613_v51 }
 0x80d   :  { %2245 = vpow2.f32 %v1614_v57 }
 0x80e   :  { %2247 = vtanh.f32 %v1508_v4 }
 0x815   :  { %v2242_v22 = vpop.eup %2241 }
 0x816   :  { %v2244_v59 = vpop.eup %2243  ;;  %v1513_v60 = vadd.f32 1.0, %v2242_v22 }
 0x817   :  { %v1519_v61 = vadd.f32 1.0, %v2244_v59  ;;  %v2246_v63 = vpop.eup %2245 }
 0x818   :  { %2249 = vrcp.f32 %v1513_v60  ;;  %v2248_v1 = vpop.eup %2247  ;;  %v1526_v11 = vadd.f32 1.0, %v2246_v63 }
 0x819   :  { %2251 = vrcp.f32 %v1519_v61 }
 0x81a   :  { %2253 = vrcp.f32 %v1526_v11 }
 0x822   :  { %v2250_v2 = vpop.eup %2249 }
 0x823   :  { %v2252_v5 = vpop.eup %2251  ;;  %v1530_v6 = vmul.f32 %v2250_v2, %v2248_v1 }
 0x824   :  { %v1529_v12 = vmul.f32 %v2252_v5, %v1350_v32  ;;  %v2254_v16 = vpop.eup %2253 }
 0x826   :  { %v1531_v13 = vadd.f32 %v1530_v6, %v1529_v12 }
 0x828   :  { %2255 = vtanh.f32 %v1531_v13  ;;  %1544 = vst [vmem:[%s2982_s6] sm:$0xff] %v1531_v13 }
 0x832   :  { %v2256_v19 = vpop.eup %2255 }
 0x833   :  { %v1533_v20 = vmul.f32 %v2256_v19, %v2254_v16 }
 0x835   :  { %1615 = vst [vmem:[%s2981_s4 + $0x38] sm:$0xff] %v1533_v20  ;;  %1542 = vst [vmem:[%s2983_s5] sm:$0xff] %v1533_v20 }

</bundles_post_ra>
